<compile_context>
chip_gen: v7x
topology: tpu7x:2x2x1
jax: 0.10.0
libtpu: 0.0.40
codegen_flags: <defaults>
</compile_context>

<pallas_src>
import functools

import jax
import jax.numpy as jnp
from jax.experimental import pallas as pl
from jax.experimental.pallas import tpu as pltpu

NUM_RES_BLOCKS = 4


def _round_up(a, b):
    return ((a + b - 1) // b) * b


def drnn_kernel(x_ref, w_in_ref, b_in_ref, w1_ref, b1_ref, w2_ref, b2_ref,
                w_out_ref, b_out_ref, o_ref, *, num_blocks):
    # ---- Input linear (2 -> m), done on the VPU: a K=2 MXU matmul would be
    # >98% idle systolic array + fill/drain latency.  Two broadcast FMAs instead.
    #   w_in[:, j:j+1] : [m, 1],  x[j:j+1, :] : [1, TILE_N]  ->  [m, TILE_N]
    h = (w_in_ref[:, 0:1] * x_ref[0:1, :]
         + w_in_ref[:, 1:2] * x_ref[1:2, :]
         + b_in_ref[...])

    # ---- 4 residual blocks: tanh(W2 @ tanh(W1 @ h + b1) + b2) + h
    # m x m x TILE_N matmuls: lane-dense MXU work, f32 accumulation.
    for i in range(num_blocks):  # static unrolled loop (num_blocks is small & fixed)
        t = jnp.tanh(jnp.dot(w1_ref[i], h,
                             preferred_element_type=jnp.float32) + b1_ref[i])
        t = jnp.tanh(jnp.dot(w2_ref[i], t,
                             preferred_element_type=jnp.float32) + b2_ref[i])
        h = t + h

    # ---- Output linear (m -> 1): VPU multiply + sublane (XLU) reduction.
    # Avoids a degenerate 1-column MXU matmul and yields a lane-dense [1, TILE_N]
    # result for an unmasked store.
    out = jnp.sum(w_out_ref[...] * h, axis=0, keepdims=True) + b_out_ref[...]
    o_ref[...] = out.astype(o_ref.dtype)


def drnn_forward(x, params, tile_n=512):
    (w_in, b_in, w1, b1, w2, b2, w_out, b_out) = params
    m = w_in.shape[0]
    n = x.shape[0]

    # Pad the batch to a lane-friendly multiple of the tile; padded columns are
    # computed on garbage-free zeros and sliced off at the end.
    n_lane = _round_up(max(n, 1), 128)
    tile_n = min(tile_n, n_lane)
    n_pad = _round_up(n_lane, tile_n)
    grid = (n_pad // tile_n,)

    # Features-first layout: batch on lanes.
    xt = jnp.zeros((2, n_pad), jnp.float32).at[:, :n].set(x.T.astype(jnp.float32))

    weight_bytes = int(sum(int(p.size) * p.dtype.itemsize for p in params))
    cost = pl.CostEstimate(
        flops=2 * n_pad * (2 * m + 2 * NUM_RES_BLOCKS * m * m + m),
        transcendentals=2 * NUM_RES_BLOCKS * n_pad * m,
        bytes_accessed=n_pad * 3 * 4 + weight_bytes,
    )

    out_t = pl.pallas_call(
        functools.partial(drnn_kernel, num_blocks=NUM_RES_BLOCKS),
        out_shape=jax.ShapeDtypeStruct((1, n_pad), jnp.float32),
        grid=grid,
        in_specs=[
            # batch-tiled input (pipelined / double-buffered)
            pl.BlockSpec((2, tile_n), lambda i: (0, i)),
            # weights & biases: full blocks, resident across the grid
            pl.BlockSpec((m, 2), lambda i: (0, 0)),
            pl.BlockSpec((m, 1), lambda i: (0, 0)),
            pl.BlockSpec((NUM_RES_BLOCKS, m, m), lambda i: (0, 0, 0)),
            pl.BlockSpec((NUM_RES_BLOCKS, m, 1), lambda i: (0, 0, 0)),
            pl.BlockSpec((NUM_RES_BLOCKS, m, m), lambda i: (0, 0, 0)),
            pl.BlockSpec((NUM_RES_BLOCKS, m, 1), lambda i: (0, 0, 0)),
            pl.BlockSpec((m, 1), lambda i: (0, 0)),
            pl.BlockSpec((1, 1), lambda i: (0, 0)),
        ],
        out_specs=pl.BlockSpec((1, tile_n), lambda i: (0, i)),
        compiler_params=pltpu.CompilerParams(
            dimension_semantics=("parallel",)),  # lets v7x use both TensorCores
        cost_estimate=cost,
    )(xt, w_in, b_in, w1, b1, w2, b2, w_out, b_out)

    return out_t[:, :n].T  # back to [N, 1]


def init_params(key, m):
    """Deterministic init mimicking torch.nn.Linear default U(-1/sqrt(fan_in), +),
    stored in the kernel's features-first ([out, in] / column-bias) layout."""
    keys = jax.random.split(key, 2 + 4 * NUM_RES_BLOCKS + 2)
    k = iter(keys)

    def lin(kw, kb, fan_in, fan_out):
        bound = 1.0 / float(fan_in) ** 0.5
        w = jax.random.uniform(kw, (fan_out, fan_in), jnp.float32, -bound, bound)
        b = jax.random.uniform(kb, (fan_out, 1), jnp.float32, -bound, bound)
        return w, b

    w_in, b_in = lin(next(k), next(k), 2, m)

    w1s, b1s, w2s, b2s = [], [], [], []
    for _ in range(NUM_RES_BLOCKS):
        w1, b1 = lin(next(k), next(k), m, m)
        w2, b2 = lin(next(k), next(k), m, m)
        w1s.append(w1); b1s.append(b1); w2s.append(w2); b2s.append(b2)
    w1 = jnp.stack(w1s); b1 = jnp.stack(b1s)
    w2 = jnp.stack(w2s); b2 = jnp.stack(b2s)

    w_out_row, b_out = lin(next(k), next(k), m, 1)   # [1, m], [1, 1]
    w_out = w_out_row.T                              # [m, 1] column for the kernel
    return (w_in, b_in, w1, b1, w2, b2, w_out, b_out)


def drnn_reference(x, params):
    """Pure-JAX reference, numerically matching the torch module semantics."""
    (w_in, b_in, w1, b1, w2, b2, w_out, b_out) = params
    h = x @ w_in.T + b_in[:, 0]
    for i in range(NUM_RES_BLOCKS):
        t = jnp.tanh(h @ w1[i].T + b1[i, :, 0])
        t = jnp.tanh(t @ w2[i].T + b2[i, :, 0])
        h = t + h
    return h @ w_out + b_out[:, 0]


if __name__ == "__main__":
    m = 32        # hidden width
    batch = 1000  # number of (x, t) sample points -> exercises padding + a 2-tile grid

    key = jax.random.PRNGKey(0)
    k_param, k_x = jax.random.split(key)
    params = init_params(k_param, m)
    x = jax.random.normal(k_x, (batch, 2), dtype=jnp.float32)

    out = drnn_forward(x, params)
    out = jax.block_until_ready(out)

    ref = drnn_reference(x, params)
    assert out.shape == (batch, 1), out.shape
    assert jnp.allclose(out, ref, rtol=1e-4, atol=1e-5), \
        float(jnp.max(jnp.abs(out - ref)))

    print("KERNEL_OK")
</pallas_src>

<mosaic_0001>
module attributes {stable_mosaic.version = 11 : i64} {
  func.func @drnn_kernel(%arg0: i32, %arg1: memref<2x512xf32, #tpu.memory_space<vmem>>, %arg2: memref<32x2xf32, #tpu.memory_space<vmem>>, %arg3: memref<32x1xf32, #tpu.memory_space<vmem>>, %arg4: memref<4x32x32xf32, #tpu.memory_space<vmem>>, %arg5: memref<4x32x1xf32, #tpu.memory_space<vmem>>, %arg6: memref<4x32x32xf32, #tpu.memory_space<vmem>>, %arg7: memref<4x32x1xf32, #tpu.memory_space<vmem>>, %arg8: memref<32x1xf32, #tpu.memory_space<vmem>>, %arg9: memref<1x1xf32, #tpu.memory_space<vmem>>, %arg10: memref<1x512xf32, #tpu.memory_space<vmem>>) attributes {dimension_semantics = [#tpu.dimension_semantics<parallel>], iteration_bounds = array<i64: 2>, scalar_prefetch = 0 : i64, scratch_operands = 0 : i64, tpu.core_type = #tpu.core_type<tc>, window_params = [{transform_indices = @transform_0, window_bounds = array<i64: 2, 512>}, {pipeline_mode = #tpu.pipeline_mode<synchronous>, transform_indices = @transform_1, window_bounds = array<i64: 32, 2>}, {pipeline_mode = #tpu.pipeline_mode<synchronous>, transform_indices = @transform_2, window_bounds = array<i64: 32, 1>}, {pipeline_mode = #tpu.pipeline_mode<synchronous>, transform_indices = @transform_3, window_bounds = array<i64: 4, 32, 32>}, {pipeline_mode = #tpu.pipeline_mode<synchronous>, transform_indices = @transform_4, window_bounds = array<i64: 4, 32, 1>}, {pipeline_mode = #tpu.pipeline_mode<synchronous>, transform_indices = @transform_5, window_bounds = array<i64: 4, 32, 32>}, {pipeline_mode = #tpu.pipeline_mode<synchronous>, transform_indices = @transform_6, window_bounds = array<i64: 4, 32, 1>}, {pipeline_mode = #tpu.pipeline_mode<synchronous>, transform_indices = @transform_7, window_bounds = array<i64: 32, 1>}, {pipeline_mode = #tpu.pipeline_mode<synchronous>, transform_indices = @transform_8, window_bounds = array<i64: 1, 1>}, {transform_indices = @transform_9, window_bounds = array<i64: 1, 512>}]} {
    %c0 = arith.constant 0 : index
    %c0_0 = arith.constant 0 : index
    %0 = vector.load %arg2[%c0, %c0_0] : memref<32x2xf32, #tpu.memory_space<vmem>>, vector<32x1xf32>
    %c0_1 = arith.constant 0 : index
    %c0_2 = arith.constant 0 : index
    %1 = vector.load %arg1[%c0_1, %c0_2] : memref<2x512xf32, #tpu.memory_space<vmem>>, vector<1x512xf32>
    %2 = vector.broadcast %0 : vector<32x1xf32> to vector<32x512xf32>
    %3 = vector.broadcast %1 : vector<1x512xf32> to vector<32x512xf32>
    %4 = arith.mulf %2, %3 : vector<32x512xf32>
    %c0_3 = arith.constant 0 : index
    %c1 = arith.constant 1 : index
    %5 = vector.load %arg2[%c0_3, %c1] : memref<32x2xf32, #tpu.memory_space<vmem>>, vector<32x1xf32>
    %c1_4 = arith.constant 1 : index
    %c0_5 = arith.constant 0 : index
    %6 = vector.load %arg1[%c1_4, %c0_5] : memref<2x512xf32, #tpu.memory_space<vmem>>, vector<1x512xf32>
    %7 = vector.broadcast %5 : vector<32x1xf32> to vector<32x512xf32>
    %8 = vector.broadcast %6 : vector<1x512xf32> to vector<32x512xf32>
    %9 = arith.mulf %7, %8 : vector<32x512xf32>
    %10 = arith.addf %4, %9 : vector<32x512xf32>
    %c0_6 = arith.constant 0 : index
    %c0_7 = arith.constant 0 : index
    %11 = vector.load %arg3[%c0_6, %c0_7] : memref<32x1xf32, #tpu.memory_space<vmem>>, vector<32x1xf32>
    %12 = vector.broadcast %11 : vector<32x1xf32> to vector<32x512xf32>
    %13 = arith.addf %10, %12 : vector<32x512xf32>
    %c0_8 = arith.constant 0 : index
    %c0_9 = arith.constant 0 : index
    %c0_10 = arith.constant 0 : index
    %14 = vector.load %arg4[%c0_8, %c0_9, %c0_10] : memref<4x32x32xf32, #tpu.memory_space<vmem>>, vector<1x32x32xf32>
    %15 = vector.shape_cast %14 : vector<1x32x32xf32> to vector<32x32xf32>
    %cst = arith.constant dense<0.000000e+00> : vector<32x512xf32>
    %16 = tpu.matmul %15, %13, %cst {dimension_numbers = #tpu.dot_dimension_numbers<[1], [0], [0], [1], [0, 0, 1, 1], [], []>} : vector<32x32xf32>, vector<32x512xf32>, vector<32x512xf32> -> vector<32x512xf32>
    %c0_11 = arith.constant 0 : index
    %c0_12 = arith.constant 0 : index
    %c0_13 = arith.constant 0 : index
    %17 = vector.load %arg5[%c0_11, %c0_12, %c0_13] : memref<4x32x1xf32, #tpu.memory_space<vmem>>, vector<1x32x1xf32>
    %18 = vector.shape_cast %17 : vector<1x32x1xf32> to vector<32x1xf32>
    %19 = vector.broadcast %18 : vector<32x1xf32> to vector<32x512xf32>
    %20 = arith.addf %16, %19 : vector<32x512xf32>
    %21 = math.tanh %20 : vector<32x512xf32>
    %c0_14 = arith.constant 0 : index
    %c0_15 = arith.constant 0 : index
    %c0_16 = arith.constant 0 : index
    %22 = vector.load %arg6[%c0_14, %c0_15, %c0_16] : memref<4x32x32xf32, #tpu.memory_space<vmem>>, vector<1x32x32xf32>
    %23 = vector.shape_cast %22 : vector<1x32x32xf32> to vector<32x32xf32>
    %cst_17 = arith.constant dense<0.000000e+00> : vector<32x512xf32>
    %24 = tpu.matmul %23, %21, %cst_17 {dimension_numbers = #tpu.dot_dimension_numbers<[1], [0], [0], [1], [0, 0, 1, 1], [], []>} : vector<32x32xf32>, vector<32x512xf32>, vector<32x512xf32> -> vector<32x512xf32>
    %c0_18 = arith.constant 0 : index
    %c0_19 = arith.constant 0 : index
    %c0_20 = arith.constant 0 : index
    %25 = vector.load %arg7[%c0_18, %c0_19, %c0_20] : memref<4x32x1xf32, #tpu.memory_space<vmem>>, vector<1x32x1xf32>
    %26 = vector.shape_cast %25 : vector<1x32x1xf32> to vector<32x1xf32>
    %27 = vector.broadcast %26 : vector<32x1xf32> to vector<32x512xf32>
    %28 = arith.addf %24, %27 : vector<32x512xf32>
    %29 = math.tanh %28 : vector<32x512xf32>
    %30 = arith.addf %29, %13 : vector<32x512xf32>
    %c1_21 = arith.constant 1 : index
    %c0_22 = arith.constant 0 : index
    %c0_23 = arith.constant 0 : index
    %31 = vector.load %arg4[%c1_21, %c0_22, %c0_23] : memref<4x32x32xf32, #tpu.memory_space<vmem>>, vector<1x32x32xf32>
    %32 = vector.shape_cast %31 : vector<1x32x32xf32> to vector<32x32xf32>
    %cst_24 = arith.constant dense<0.000000e+00> : vector<32x512xf32>
    %33 = tpu.matmul %32, %30, %cst_24 {dimension_numbers = #tpu.dot_dimension_numbers<[1], [0], [0], [1], [0, 0, 1, 1], [], []>} : vector<32x32xf32>, vector<32x512xf32>, vector<32x512xf32> -> vector<32x512xf32>
    %c1_25 = arith.constant 1 : index
    %c0_26 = arith.constant 0 : index
    %c0_27 = arith.constant 0 : index
    %34 = vector.load %arg5[%c1_25, %c0_26, %c0_27] : memref<4x32x1xf32, #tpu.memory_space<vmem>>, vector<1x32x1xf32>
    %35 = vector.shape_cast %34 : vector<1x32x1xf32> to vector<32x1xf32>
    %36 = vector.broadcast %35 : vector<32x1xf32> to vector<32x512xf32>
    %37 = arith.addf %33, %36 : vector<32x512xf32>
    %38 = math.tanh %37 : vector<32x512xf32>
    %c1_28 = arith.constant 1 : index
    %c0_29 = arith.constant 0 : index
    %c0_30 = arith.constant 0 : index
    %39 = vector.load %arg6[%c1_28, %c0_29, %c0_30] : memref<4x32x32xf32, #tpu.memory_space<vmem>>, vector<1x32x32xf32>
    %40 = vector.shape_cast %39 : vector<1x32x32xf32> to vector<32x32xf32>
    %cst_31 = arith.constant dense<0.000000e+00> : vector<32x512xf32>
    %41 = tpu.matmul %40, %38, %cst_31 {dimension_numbers = #tpu.dot_dimension_numbers<[1], [0], [0], [1], [0, 0, 1, 1], [], []>} : vector<32x32xf32>, vector<32x512xf32>, vector<32x512xf32> -> vector<32x512xf32>
    %c1_32 = arith.constant 1 : index
    %c0_33 = arith.constant 0 : index
    %c0_34 = arith.constant 0 : index
    %42 = vector.load %arg7[%c1_32, %c0_33, %c0_34] : memref<4x32x1xf32, #tpu.memory_space<vmem>>, vector<1x32x1xf32>
    %43 = vector.shape_cast %42 : vector<1x32x1xf32> to vector<32x1xf32>
    %44 = vector.broadcast %43 : vector<32x1xf32> to vector<32x512xf32>
    %45 = arith.addf %41, %44 : vector<32x512xf32>
    %46 = math.tanh %45 : vector<32x512xf32>
    %47 = arith.addf %46, %30 : vector<32x512xf32>
    %c2 = arith.constant 2 : index
    %c0_35 = arith.constant 0 : index
    %c0_36 = arith.constant 0 : index
    %48 = vector.load %arg4[%c2, %c0_35, %c0_36] : memref<4x32x32xf32, #tpu.memory_space<vmem>>, vector<1x32x32xf32>
    %49 = vector.shape_cast %48 : vector<1x32x32xf32> to vector<32x32xf32>
    %cst_37 = arith.constant dense<0.000000e+00> : vector<32x512xf32>
    %50 = tpu.matmul %49, %47, %cst_37 {dimension_numbers = #tpu.dot_dimension_numbers<[1], [0], [0], [1], [0, 0, 1, 1], [], []>} : vector<32x32xf32>, vector<32x512xf32>, vector<32x512xf32> -> vector<32x512xf32>
    %c2_38 = arith.constant 2 : index
    %c0_39 = arith.constant 0 : index
    %c0_40 = arith.constant 0 : index
    %51 = vector.load %arg5[%c2_38, %c0_39, %c0_40] : memref<4x32x1xf32, #tpu.memory_space<vmem>>, vector<1x32x1xf32>
    %52 = vector.shape_cast %51 : vector<1x32x1xf32> to vector<32x1xf32>
    %53 = vector.broadcast %52 : vector<32x1xf32> to vector<32x512xf32>
    %54 = arith.addf %50, %53 : vector<32x512xf32>
    %55 = math.tanh %54 : vector<32x512xf32>
    %c2_41 = arith.constant 2 : index
    %c0_42 = arith.constant 0 : index
    %c0_43 = arith.constant 0 : index
    %56 = vector.load %arg6[%c2_41, %c0_42, %c0_43] : memref<4x32x32xf32, #tpu.memory_space<vmem>>, vector<1x32x32xf32>
    %57 = vector.shape_cast %56 : vector<1x32x32xf32> to vector<32x32xf32>
    %cst_44 = arith.constant dense<0.000000e+00> : vector<32x512xf32>
    %58 = tpu.matmul %57, %55, %cst_44 {dimension_numbers = #tpu.dot_dimension_numbers<[1], [0], [0], [1], [0, 0, 1, 1], [], []>} : vector<32x32xf32>, vector<32x512xf32>, vector<32x512xf32> -> vector<32x512xf32>
    %c2_45 = arith.constant 2 : index
    %c0_46 = arith.constant 0 : index
    %c0_47 = arith.constant 0 : index
    %59 = vector.load %arg7[%c2_45, %c0_46, %c0_47] : memref<4x32x1xf32, #tpu.memory_space<vmem>>, vector<1x32x1xf32>
    %60 = vector.shape_cast %59 : vector<1x32x1xf32> to vector<32x1xf32>
    %61 = vector.broadcast %60 : vector<32x1xf32> to vector<32x512xf32>
    %62 = arith.addf %58, %61 : vector<32x512xf32>
    %63 = math.tanh %62 : vector<32x512xf32>
    %64 = arith.addf %63, %47 : vector<32x512xf32>
    %c3 = arith.constant 3 : index
    %c0_48 = arith.constant 0 : index
    %c0_49 = arith.constant 0 : index
    %65 = vector.load %arg4[%c3, %c0_48, %c0_49] : memref<4x32x32xf32, #tpu.memory_space<vmem>>, vector<1x32x32xf32>
    %66 = vector.shape_cast %65 : vector<1x32x32xf32> to vector<32x32xf32>
    %cst_50 = arith.constant dense<0.000000e+00> : vector<32x512xf32>
    %67 = tpu.matmul %66, %64, %cst_50 {dimension_numbers = #tpu.dot_dimension_numbers<[1], [0], [0], [1], [0, 0, 1, 1], [], []>} : vector<32x32xf32>, vector<32x512xf32>, vector<32x512xf32> -> vector<32x512xf32>
    %c3_51 = arith.constant 3 : index
    %c0_52 = arith.constant 0 : index
    %c0_53 = arith.constant 0 : index
    %68 = vector.load %arg5[%c3_51, %c0_52, %c0_53] : memref<4x32x1xf32, #tpu.memory_space<vmem>>, vector<1x32x1xf32>
    %69 = vector.shape_cast %68 : vector<1x32x1xf32> to vector<32x1xf32>
    %70 = vector.broadcast %69 : vector<32x1xf32> to vector<32x512xf32>
    %71 = arith.addf %67, %70 : vector<32x512xf32>
    %72 = math.tanh %71 : vector<32x512xf32>
    %c3_54 = arith.constant 3 : index
    %c0_55 = arith.constant 0 : index
    %c0_56 = arith.constant 0 : index
    %73 = vector.load %arg6[%c3_54, %c0_55, %c0_56] : memref<4x32x32xf32, #tpu.memory_space<vmem>>, vector<1x32x32xf32>
    %74 = vector.shape_cast %73 : vector<1x32x32xf32> to vector<32x32xf32>
    %cst_57 = arith.constant dense<0.000000e+00> : vector<32x512xf32>
    %75 = tpu.matmul %74, %72, %cst_57 {dimension_numbers = #tpu.dot_dimension_numbers<[1], [0], [0], [1], [0, 0, 1, 1], [], []>} : vector<32x32xf32>, vector<32x512xf32>, vector<32x512xf32> -> vector<32x512xf32>
    %c3_58 = arith.constant 3 : index
    %c0_59 = arith.constant 0 : index
    %c0_60 = arith.constant 0 : index
    %76 = vector.load %arg7[%c3_58, %c0_59, %c0_60] : memref<4x32x1xf32, #tpu.memory_space<vmem>>, vector<1x32x1xf32>
    %77 = vector.shape_cast %76 : vector<1x32x1xf32> to vector<32x1xf32>
    %78 = vector.broadcast %77 : vector<32x1xf32> to vector<32x512xf32>
    %79 = arith.addf %75, %78 : vector<32x512xf32>
    %80 = math.tanh %79 : vector<32x512xf32>
    %81 = arith.addf %80, %64 : vector<32x512xf32>
    %c0_61 = arith.constant 0 : index
    %c0_62 = arith.constant 0 : index
    %82 = vector.load %arg8[%c0_61, %c0_62] : memref<32x1xf32, #tpu.memory_space<vmem>>, vector<32x1xf32>
    %83 = vector.broadcast %82 : vector<32x1xf32> to vector<32x512xf32>
    %84 = arith.mulf %83, %81 : vector<32x512xf32>
    %cst_63 = arith.constant dense<0.000000e+00> : vector<512xf32>
    %85 = vector.multi_reduction <add>, %84, %cst_63 [0] : vector<32x512xf32> to vector<512xf32>
    %86 = vector.shape_cast %85 : vector<512xf32> to vector<1x512xf32>
    %c0_64 = arith.constant 0 : index
    %c0_65 = arith.constant 0 : index
    %87 = vector.load %arg9[%c0_64, %c0_65] : memref<1x1xf32, #tpu.memory_space<vmem>>, vector<1x1xf32>
    %88 = vector.broadcast %87 : vector<1x1xf32> to vector<1x512xf32>
    %89 = arith.addf %86, %88 : vector<1x512xf32>
    %c0_66 = arith.constant 0 : index
    %c0_67 = arith.constant 0 : index
    %90 = vector.load %arg10[%c0_66, %c0_67] : memref<1x512xf32, #tpu.memory_space<vmem>>, vector<1x512xf32>
    tpu.vector_store %arg10[%c0_66, %c0_67], %89 {strides = array<i32>} : memref<1x512xf32, #tpu.memory_space<vmem>>, vector<1x512xf32>,
    return
  }
  func.func @transform_0(%arg0: i32) -> (i32, i32) {
    %c0_i32 = arith.constant 0 : i32
    %c0_i32_0 = arith.constant 0 : i32
    return %c0_i32, %arg0 : i32, i32
  }
  func.func @transform_1(%arg0: i32) -> (i32, i32) {
    %c0_i32 = arith.constant 0 : i32
    %c0_i32_0 = arith.constant 0 : i32
    %c0_i32_1 = arith.constant 0 : i32
    return %c0_i32, %c0_i32_0 : i32, i32
  }
  func.func @transform_2(%arg0: i32) -> (i32, i32) {
    %c0_i32 = arith.constant 0 : i32
    %c0_i32_0 = arith.constant 0 : i32
    %c0_i32_1 = arith.constant 0 : i32
    return %c0_i32, %c0_i32_0 : i32, i32
  }
  func.func @transform_3(%arg0: i32) -> (i32, i32, i32) {
    %c0_i32 = arith.constant 0 : i32
    %c0_i32_0 = arith.constant 0 : i32
    %c0_i32_1 = arith.constant 0 : i32
    %c0_i32_2 = arith.constant 0 : i32
    return %c0_i32, %c0_i32_0, %c0_i32_1 : i32, i32, i32
  }
  func.func @transform_4(%arg0: i32) -> (i32, i32, i32) {
    %c0_i32 = arith.constant 0 : i32
    %c0_i32_0 = arith.constant 0 : i32
    %c0_i32_1 = arith.constant 0 : i32
    %c0_i32_2 = arith.constant 0 : i32
    return %c0_i32, %c0_i32_0, %c0_i32_1 : i32, i32, i32
  }
  func.func @transform_5(%arg0: i32) -> (i32, i32, i32) {
    %c0_i32 = arith.constant 0 : i32
    %c0_i32_0 = arith.constant 0 : i32
    %c0_i32_1 = arith.constant 0 : i32
    %c0_i32_2 = arith.constant 0 : i32
    return %c0_i32, %c0_i32_0, %c0_i32_1 : i32, i32, i32
  }
  func.func @transform_6(%arg0: i32) -> (i32, i32, i32) {
    %c0_i32 = arith.constant 0 : i32
    %c0_i32_0 = arith.constant 0 : i32
    %c0_i32_1 = arith.constant 0 : i32
    %c0_i32_2 = arith.constant 0 : i32
    return %c0_i32, %c0_i32_0, %c0_i32_1 : i32, i32, i32
  }
  func.func @transform_7(%arg0: i32) -> (i32, i32) {
    %c0_i32 = arith.constant 0 : i32
    %c0_i32_0 = arith.constant 0 : i32
    %c0_i32_1 = arith.constant 0 : i32
    return %c0_i32, %c0_i32_0 : i32, i32
  }
  func.func @transform_8(%arg0: i32) -> (i32, i32) {
    %c0_i32 = arith.constant 0 : i32
    %c0_i32_0 = arith.constant 0 : i32
    %c0_i32_1 = arith.constant 0 : i32
    return %c0_i32, %c0_i32_0 : i32, i32
  }
  func.func @transform_9(%arg0: i32) -> (i32, i32) {
    %c0_i32 = arith.constant 0 : i32
    %c0_i32_0 = arith.constant 0 : i32
    return %c0_i32, %arg0 : i32, i32
  }
}

</mosaic_0001>

<bundles_post_ra>
// kernel: tpu_custom_call.1
= control target key start
LH: loop header
LB: loop body
LE: loop exit
PB: predicated region body
PF: predicated region fallthrough
CT: control target
= control target key end

     0   :  { %s4068_s0 = inlined_call_operand.vmem [shape: f32[2,1024], index: 0, kind: input, shape index: {}]   ;;  %s4069_s1 = inlined_call_operand.vmem [shape: f32[32,2], index: 1, kind: input, shape index: {}]   ;;  %s4070_s2 = inlined_call_operand.vmem [shape: f32[32,1], index: 2, kind: input, shape index: {}]   ;;  %s4071_s3 = inlined_call_operand.vmem [shape: f32[4,32,32], index: 3, kind: input, shape index: {}]   ;;  %s4072_s4 = inlined_call_operand.vmem [shape: f32[4,32,1], index: 4, kind: input, shape index: {}]   ;;  %s4073_s5 = inlined_call_operand.vmem [shape: f32[4,32,32], index: 5, kind: input, shape index: {}]   ;;  %s4074_s6 = inlined_call_operand.vmem [shape: f32[4,32,1], index: 6, kind: input, shape index: {}]   ;;  %s4075_s7 = inlined_call_operand.vmem [shape: f32[32,1], index: 7, kind: input, shape index: {}]   ;;  %s4076_s8 = inlined_call_operand.<no memory space> [shape: f32[1,1], index: 8, kind: input, shape index: {}]   ;;  %s4077_s9 = inlined_call_operand.hbm [shape: f32[1,1024], index: 9, kind: output, shape index: {}]  }
   0x1   :  { %v14_v0 = vstv %s4076_s8 }
   0x2   :  { %15 = vst [vmem:[#allocation2] sm:$0x1] %v14_v0 }
   0x3   :  { %16 = vsyncpa [#allocation4], 0 }
   0x4   :  { %18 = vsyncpa [#allocation4 + $0x1], 0  ;;  %s3337_s11 = smov 0   ;;  %s3339_s12 = smov 0  }
   0x5   :  { %s3341_s13 = smov 0   ;;  %s3343_s14 = smov 0  }
   0x6 LB: > { %s3358_s8 = sadd.s32 4294967295, %s3277_s14   ;;  %s2656_s15 = sadd.s32 4294967294, %s3277_s14   ;;  %s3277_s14 = sphi %s3343_s14, %s4083_s14   ;;  %s3273_s13 = sphi %s3341_s13, %s4082_s13   ;;  %s3269_s12 = sphi %s3339_s12, %s4081_s12   ;;  %s3265_s11 = sphi %s3337_s11, %s4080_s11  }
   0x7   : > { %s3362_s16 = sadd.s32 1, %s3277_s14   ;;  %s225_s17 = sadd.s32 1, %s3273_s13 }
   0x8   : > { %s222_s18 = ssub.s32 %s3277_s14, %s3362_s16  ;;  %p235_p0 = scmp.ne.s32.totalorder %s3273_s13, %s3269_s12 }
   0x9   : > { %p223_p1 = scmp.eq.s32.totalorder %s222_s18, 0  ;;  %p236_p2 = scmp.eq.s32.totalorder %s3358_s8, 1 }
   0xa   : > { %p241_p3 = scmp.ne.s32.totalorder %s3269_s12, %s3265_s11  ;;  %p242_p4 = scmp.eq.s32.totalorder %s2656_s15, 1 }
   0xb   : > { %s3373_s19 = scalar_select %p223_p1, %s3273_s13, %s225_s17  }
   0xc   : > { %p3375_p5 = por %p236_p2, %p235_p0  ;;  %p3379_p6 = por %p242_p4, %p241_p3 }
   0xd   : > { %p2659_p7 = scmp.ge.s32.totalorder %s3277_s14, 1  ;;  %p293_p8 = scmp.lt.s32.totalorder %s3277_s14, 3 }
   0xf   : > { %p294_p9 = pnand %p2659_p7, %p293_p8 }
  0x10   : > { %v338_v1 = vld [vmem:[%s4069_s1 + $0x10] sm:$0xff] (!%p294_p9)  ;;  %v336_v2 = vld [vmem:[%s4069_s1] sm:$0xff] (!%p294_p9)  ;;  %v3279_v3 = vmov (!%p294_p9), 1   ;;  %v337_v4 = vld [vmem:[%s4069_s1 + $0x8] sm:$0xff] (!%p294_p9)  ;;  %v3280_v5 = vmov (!%p294_p9), 0   ;;  %v3281_v17 = vmov (!%p294_p9), 0.0   ;;  %v362_v49 = vlaneseq (!%p294_p9) }
  0x11   : > { %297 = sbr.rel (%p294_p9) target bundleno = 2184 (0x888), region = 56  ;;  %2955 = vset.pattern.permute.xlu0 (!%p294_p9), %v3279_v3  ;;  %2953 = vset.pattern.permute.xlu1 (!%p294_p9), %v3279_v3  ;;  %v339_v6 = vld [vmem:[%s4069_s1 + $0x18] sm:$0xff] (!%p294_p9)  ;;  %v470_v7 = vld [vmem:[%s4070_s2 + $0x8] sm:$0xff] (!%p294_p9)  ;;  %v469_v8 = vld [vmem:[%s4070_s2] sm:$0xff] (!%p294_p9)  ;;  %s2661_s15 = sshll.u32 (!%p294_p9), %s3358_s8, 2  ;;  %vm537_vm0 = vcmask (!%p294_p9), 261120  }
  0x12   : > { %409 = vperm.xlu0 (!%p294_p9), %2955, %v338_v1   ;;  %401 = vperm.xlu1 (!%p294_p9), %2953, %v336_v2   ;;  %v513_v9 = vld [vmem:[%s4072_s4] sm:$0xff] (!%p294_p9)  ;;  %v471_v10 = vld [vmem:[%s4070_s2 + $0x10] sm:$0xff] (!%p294_p9)  ;;  %v472_v12 = vld [vmem:[%s4070_s2 + $0x18] sm:$0xff] (!%p294_p9)  ;;  %p330_p10 = scmp.lt.s32.totalorder (!%p294_p9), %s2661_s15, 7  ;;  %v3521_v50 = vshrl.u32 (!%p294_p9), %v362_v49, 7  ;;  %s2781_s25 = sshll.u32 (!%p294_p9), %s3358_s8, 6 }
  0x13   : > { %v515_v11 = vld [vmem:[%s4072_s4 + $0x10] sm:$0xff] (!%p294_p9)  ;;  %v748_v13 = vld [vmem:[%s4074_s6] sm:$0xff] (!%p294_p9)  ;;  %v514_v14 = vld [vmem:[%s4072_s4 + $0x8] sm:$0xff] (!%p294_p9)  ;;  %614 = vmatprep.mubr.f32.mxu0 (!%p294_p9), %v3281_v17  ;;  %703 = vmatprep.mubr.f32.mxu1 (!%p294_p9), %v3281_v17  ;;  %vm2579_vm1 = vcmp.lt.s32.totalorder (!%p294_p9), %v362_v49, 512  ;;  %s4026_s30 = scalar_lea.hbm (!%p294_p9), %s4077_s9, %s2781_s25  ;;  %s3283_s8 = smov (!%p294_p9), [#allocation3]  }
  0x14   : > { %v750_v15 = vld [vmem:[%s4074_s6 + $0x10] sm:$0xff] (!%p294_p9)  ;;  %v516_v16 = vld [vmem:[%s4072_s4 + $0x18] sm:$0xff] (!%p294_p9)  ;;  %v2684_v18 = vld [vmem:[%s4072_s4 + $0x20] sm:$0xff] (!%p294_p9)  ;;  %v3529_v53 = vsub.s32 (!%p294_p9), 0, %v3521_v50  ;;  %v368_v58 = vsub.s32 (!%p294_p9), 1, %v3521_v50  ;;  %v372_v59 = vsub.s32 (!%p294_p9), 2, %v3521_v50 }
  0x15   : > { %v749_v19 = vld [vmem:[%s4074_s6 + $0x8] sm:$0xff] (!%p294_p9)  ;;  %v2686_v20 = vld [vmem:[%s4072_s4 + $0x30] sm:$0xff] (!%p294_p9)  ;;  %v751_v21 = vld [vmem:[%s4074_s6 + $0x18] sm:$0xff] (!%p294_p9)  ;;  %v376_v60 = vsub.s32 (!%p294_p9), 3, %v3521_v50 }
  0x16   : > { %2956 = vset.pattern.permute.xlu0 (!%p294_p9), %v3280_v5  ;;  %405 = vperm.xlu1 (!%p294_p9), %2953, %v337_v4   ;;  %v2700_v22 = vld [vmem:[%s4074_s6 + $0x20] sm:$0xff] (!%p294_p9)  ;;  %v2685_v23 = vld [vmem:[%s4072_s4 + $0x28] sm:$0xff] (!%p294_p9)  ;;  %v2702_v24 = vld [vmem:[%s4074_s6 + $0x30] sm:$0xff] (!%p294_p9) }
  0x17   : > { %343 = vperm.xlu0 (!%p294_p9), %2956, %v336_v2   ;;  %v2687_v25 = vld [vmem:[%s4072_s4 + $0x38] sm:$0xff] (!%p294_p9)  ;;  %v2716_v26 = vld [vmem:[%s4072_s4 + $0x40] sm:$0xff] (!%p294_p9)  ;;  %v2701_v27 = vld [vmem:[%s4074_s6 + $0x28] sm:$0xff] (!%p294_p9) }
  0x18   : > { %v2718_v28 = vld [vmem:[%s4072_s4 + $0x50] sm:$0xff]  ;;  %v2703_v29 = vld [vmem:[%s4074_s6 + $0x38] sm:$0xff]  ;;  %v2732_v30 = vld [vmem:[%s4074_s6 + $0x40] sm:$0xff]  ;;  %s4085_s15 = smov (!%p330_p10, %s2661_s15), 7 }
  0x19   : > { %v2717_v31 = vld [vmem:[%s4072_s4 + $0x48] sm:$0xff]  ;;  %v2734_v32 = vld [vmem:[%s4074_s6 + $0x50] sm:$0xff]  ;;  %v2719_v33 = vld [vmem:[%s4072_s4 + $0x58] sm:$0xff]  ;;  %s2662_s17 = sshll.u32 %s4085_s15, 1 }
  0x1a   : > { %2954 = vset.pattern.permute.xlu1 %v3280_v5  ;;  %v2748_v34 = vld [vmem:[%s4072_s4 + $0x60] sm:$0xff]  ;;  %v2733_v35 = vld [vmem:[%s4074_s6 + $0x48] sm:$0xff]  ;;  %v2750_v36 = vld [vmem:[%s4072_s4 + $0x70] sm:$0xff]  ;;  %s333_s23 = scalar_lea.vmem %s4068_s0, %s2662_s17  ;;  %s3219_s17 = sshll.u32 %s3283_s8, 4  ;;  %s3220_s17 = int_to_ptr.vmem [resolvable:$false] %s3219_s17 }
  0x1b   : > { %348 = vperm.xlu0 %2956, %v337_v4   ;;  %358 = vperm.xlu1 %2954, %v339_v6   ;;  %v2735_v37 = vld [vmem:[%s4074_s6 + $0x58] sm:$0xff]  ;;  %v2764_v38 = vld [vmem:[%s4074_s6 + $0x60] sm:$0xff]  ;;  %v2749_v39 = vld [vmem:[%s4072_s4 + $0x68] sm:$0xff]  ;;  %s3221_s18 = scalar_lea.vmem %s3220_s17, 128 }
  0x1c   : > { %v2766_v40 = vld [vmem:[%s4074_s6 + $0x70] sm:$0xff]  ;;  %v2751_v41 = vld [vmem:[%s4072_s4 + $0x78] sm:$0xff]  ;;  %v2458_v42 = vld [vmem:[%s4075_s7] sm:$0xff] }
  0x1d   : > { %v2765_v43 = vld [vmem:[%s4074_s6 + $0x68] sm:$0xff]  ;;  %v2460_v44 = vld [vmem:[%s4075_s7 + $0x10] sm:$0xff]  ;;  %v2767_v45 = vld [vmem:[%s4074_s6 + $0x78] sm:$0xff] }
  0x1e   : > { %v2534_v46 = vld [vmem:[#allocation2] sm:$0x1]  ;;  %v2459_v47 = vld [vmem:[%s4075_s7 + $0x8] sm:$0xff]  ;;  %v2461_v48 = vld [vmem:[%s4075_s7 + $0x18] sm:$0xff] }
  0x1f   : > { %353 = vperm.xlu0 %2956, %v338_v1   ;;  %2957 = vset.pattern.permute.xlu1 %v3279_v3  ;;  %v2663_v54 = vld [vmem:[%s333_s23 + $0x1] ss:$2 sm:$0xf]  ;;  %v340_v57 = vld [vmem:[%s333_s23] ss:$2 sm:$0xf] }
  0x20   : > { %413 = vperm.xlu1 %2957, %v339_v6   ;;  %v420_v61 = vrot.slane %v2663_v54, %v3529_v53  ;;  %v365_v62 = vrot.slane %v340_v57, %v3529_v53  ;;  %v369_v63 = vrot.slane %v340_v57, %v368_v58  ;;  %v373_v0 = vrot.slane %v340_v57, %v372_v59  ;;  %s326_s23 = sand.u32 1, %s3269_s12  }
  0x21   : > { %v377_v1 = vrot.slane %v340_v57, %v376_v60  ;;  %v424_v4 = vrot.slane %v2663_v54, %v368_v58  ;;  %v432_v6 = vrot.slane %v2663_v54, %v376_v60  ;;  %s2660_s24 = sshll.u32 %s326_s23, 2  ;;  %s2583_s10 = scalar_lea.sflag [#allocation4], %s326_s23 }
  0x22   : > { %s328_s26 = scalar_lea.vmem [#allocation3], %s2660_s24 }
  0x23   : > { %480 = vperm.xlu0 %2956, %v470_v7   ;;  %s2597_s27 = sshll.u32 %s328_s26, 4  ;;  %s4028_s27 = int_to_ptr.vmem [resolvable:$true] %s2597_s27 }
  0x24   : > { %2958 = vset.pattern.permute.xlu1 %v3280_v5  ;;  %v428_v5 = vrot.slane %v2663_v54, %v372_v59  ;;  %s3215_s15 = scalar_lea.vmem %s4028_s27, 64  ;;  %p3222_p0 = scmp.lt.s32.totalorder %s4028_s27, %s3220_s17 }
  0x25   : > { %475 = vperm.xlu1 %2958, %v469_v8   ;;  %p3216_p11 = scmp.ne.s32.totalorder %s4028_s27, %s3215_s15  ;;  %p3223_p1 = scmp.lt.s32.totalorder %s3221_s18, %s3215_s15 }
  0x27   : > { %519 = vperm.xlu0 %2956, %v513_v9   ;;  %p3217_p12 = pnand %p3216_p11, %p3375_p5  ;;  %p3224_p2 = por %p3223_p1, %p3222_p0 }
  0x29   : > { %485 = vperm.xlu1 %2958, %v471_v10   ;;  %p3218_p13 = pneg %p3217_p12 }
  0x2b   : > { %529 = vperm.xlu0 %2956, %v515_v11   ;;  %p3225_p3 = pnand %p3224_p2, %p3218_p13 }
  0x2d   : > { %490 = vperm.xlu1 %2958, %v472_v12  }
  0x2f   : > { %754 = vperm.xlu0 %2956, %v748_v13  }
  0x31   : > { %524 = vperm.xlu1 %2958, %v514_v14  }
  0x33   : > { %764 = vperm.xlu0 %2956, %v750_v15  }
  0x35   : > { %534 = vperm.xlu1 %2958, %v516_v16  }
  0x37   : > { %1006 = vperm.xlu0 %2956, %v2684_v18  }
  0x39   : > { %759 = vperm.xlu1 %2958, %v749_v19  }
  0x3b   : > { %1016 = vperm.xlu0 %2956, %v2686_v20  }
  0x3d   : > { %769 = vperm.xlu1 %2958, %v751_v21  }
  0x3f   : > { %1242 = vperm.xlu0 %2956, %v2700_v22  }
  0x41   : > { %1011 = vperm.xlu1 %2958, %v2685_v23  }
  0x43   : > { %1252 = vperm.xlu0 %2956, %v2702_v24  }
  0x45   : > { %1021 = vperm.xlu1 %2958, %v2687_v25  }
  0x47   : > { %1494 = vperm.xlu0 %2956, %v2716_v26  }
  0x49   : > { %1247 = vperm.xlu1 %2958, %v2701_v27  }
  0x4b   : > { %1504 = vperm.xlu0 %2956, %v2718_v28  }
  0x4d   : > { %1257 = vperm.xlu1 %2958, %v2703_v29  }
  0x4f   : > { %1730 = vperm.xlu0 %2956, %v2732_v30  }
  0x51   : > { %1499 = vperm.xlu1 %2958, %v2717_v31  }
  0x53   : > { %1740 = vperm.xlu0 %2956, %v2734_v32  }
  0x55   : > { %1509 = vperm.xlu1 %2958, %v2719_v33  }
  0x57   : > { %1982 = vperm.xlu0 %2956, %v2748_v34  }
  0x59   : > { %1735 = vperm.xlu1 %2958, %v2733_v35  }
  0x5b   : > { %1992 = vperm.xlu0 %2956, %v2750_v36  }
  0x5d   : > { %1745 = vperm.xlu1 %2958, %v2735_v37  }
  0x5f   : > { %2218 = vperm.xlu0 %2956, %v2764_v38  }
  0x61   : > { %1987 = vperm.xlu1 %2958, %v2749_v39  }
  0x63   : > { %2228 = vperm.xlu0 %2956, %v2766_v40  }
  0x65   : > { %1997 = vperm.xlu1 %2958, %v2751_v41  }
  0x67   : > { %2464 = vperm.xlu0 %2956, %v2458_v42  }
  0x69   : > { %2223 = vperm.xlu1 %2958, %v2765_v43  }
  0x6b   : > { %2474 = vperm.xlu0 %2956, %v2460_v44  }
  0x6d   : > { %2233 = vperm.xlu1 %2958, %v2767_v45  }
  0x6f   : > { %2537 = vperm.xlu0 %2956, %v2534_v46  }
  0x71   : > { %2469 = vperm.xlu1 %2958, %v2459_v47  }
  0x75   : > { %2479 = vperm.xlu1 %2958, %v2461_v48  }
  0x91   : > { %v402_v51 = vpop.permute.xlu1 %401  ;;  %v3523_v52 = vpop.permute.xlu0 %409 }
  0x92   : > { %v437_v7 = vmul.f32 %v420_v61, %v402_v51  ;;  %v438_v18 = vmul.f32 %v424_v4, %v402_v51  ;;  %v439_v19 = vmul.f32 %v428_v5, %v402_v51  ;;  %v440_v20 = vmul.f32 %v432_v6, %v402_v51 }
  0x93   : > { %v445_v21 = vmul.f32 %v420_v61, %v3523_v52 }
  0x95   : > { %v406_v55 = vpop.permute.xlu1 %405 }
  0x96   : > { %v344_v56 = vpop.permute.xlu0 %343  ;;  %v441_v23 = vmul.f32 %v420_v61, %v406_v55  ;;  %v442_v24 = vmul.f32 %v424_v4, %v406_v55  ;;  %v443_v25 = vmul.f32 %v428_v5, %v406_v55  ;;  %v444_v26 = vmul.f32 %v432_v6, %v406_v55 }
  0x97   : > { %v382_v8 = vmul.f32 %v365_v62, %v344_v56  ;;  %v383_v9 = vmul.f32 %v369_v63, %v344_v56  ;;  %v384_v10 = vmul.f32 %v373_v0, %v344_v56  ;;  %v385_v11 = vmul.f32 %v377_v1, %v344_v56 }
  0x99   : > { %v454_v27 = vadd.f32 %v438_v18, %v383_v9  ;;  %v456_v28 = vadd.f32 %v440_v20, %v385_v11  ;;  %v453_v29 = vadd.f32 %v437_v7, %v382_v8  ;;  %v455_v30 = vadd.f32 %v439_v19, %v384_v10 }
  0x9a   : > { %v349_v2 = vpop.permute.xlu0 %348  ;;  %v359_v3 = vpop.permute.xlu1 %358  ;;  %v447_v7 = vmul.f32 %v428_v5, %v3523_v52 }
  0x9b   : > { %v386_v12 = vmul.f32 %v365_v62, %v349_v2  ;;  %v387_v13 = vmul.f32 %v369_v63, %v349_v2  ;;  %v388_v14 = vmul.f32 %v373_v0, %v349_v2  ;;  %v389_v15 = vmul.f32 %v377_v1, %v349_v2 }
  0x9c   : > { %v446_v2 = vmul.f32 %v424_v4, %v3523_v52  ;;  %v394_v8 = vmul.f32 %v365_v62, %v359_v3  ;;  %v395_v10 = vmul.f32 %v369_v63, %v359_v3  ;;  %v396_v11 = vmul.f32 %v373_v0, %v359_v3 }
  0x9d   : > { %v458_v32 = vadd.f32 %v442_v24, %v387_v13  ;;  %v460_v33 = vadd.f32 %v444_v26, %v389_v15  ;;  %v457_v34 = vadd.f32 %v441_v23, %v386_v12  ;;  %v459_v35 = vadd.f32 %v443_v25, %v388_v14  ;;  %v509_v26 = vld [vmem:[%s4071_s3] sm:$0xff] }
  0x9e   : > { %v354_v16 = vpop.permute.xlu0 %353  ;;  %v397_v12 = vmul.f32 %v377_v1, %v359_v3 }
  0x9f   : > { %v414_v22 = vpop.permute.xlu1 %413  ;;  %v390_v36 = vmul.f32 %v365_v62, %v354_v16  ;;  %v391_v37 = vmul.f32 %v369_v63, %v354_v16  ;;  %v392_v38 = vmul.f32 %v373_v0, %v354_v16  ;;  %v393_v39 = vmul.f32 %v377_v1, %v354_v16 }
  0xa0   : > { %v449_v51 = vmul.f32 %v420_v61, %v414_v22  ;;  %v450_v54 = vmul.f32 %v424_v4, %v414_v22  ;;  %v451_v55 = vmul.f32 %v428_v5, %v414_v22  ;;  %v452_v56 = vmul.f32 %v432_v6, %v414_v22 }
  0xa1   : > { %v448_v61 = vmul.f32 %v432_v6, %v3523_v52  ;;  %v461_v13 = vadd.f32 %v445_v21, %v390_v36  ;;  %v462_v14 = vadd.f32 %v446_v2, %v391_v37  ;;  %v463_v15 = vadd.f32 %v447_v7, %v392_v38 }
  0xa2   : > { %v481_v31 = vpop.permute.xlu0 %480  ;;  %v465_v18 = vadd.f32 %v449_v51, %v394_v8  ;;  %v466_v19 = vadd.f32 %v450_v54, %v395_v10  ;;  %v467_v4 = vadd.f32 %v451_v55, %v396_v11  ;;  %v468_v20 = vadd.f32 %v452_v56, %v397_v12 }
  0xa3   : > { %v3537_v41 = vadd.f32 %v481_v31, %v458_v32  ;;  %v3539_v42 = vadd.f32 %v481_v31, %v460_v33  ;;  %v3541_v43 = vadd.f32 %v481_v31, %v457_v34  ;;  %v3543_v44 = vadd.f32 %v481_v31, %v459_v35 }
  0xa4   : > { %v476_v40 = vpop.permute.xlu1 %475  ;;  %v464_v16 = vadd.f32 %v448_v61, %v393_v39 }
  0xa5   : > { %v3545_v45 = vadd.f32 %v476_v40, %v454_v27  ;;  %v3547_v46 = vadd.f32 %v476_v40, %v456_v28  ;;  %v3549_v47 = vadd.f32 %v476_v40, %v453_v29  ;;  %v3551_v48 = vadd.f32 %v476_v40, %v455_v30  ;;  %v510_v27 = vld [vmem:[%s4071_s3 + $0x8] sm:$0xff]  ;;  %v511_v28 = vld [vmem:[%s4071_s3 + $0x10] sm:$0xff]  ;;  %v512_v29 = vld [vmem:[%s4071_s3 + $0x18] sm:$0xff] }
  0xa6   : > { %v520_v30 = vpop.permute.xlu0 %519 }
  0xa7   : > { %v2782_v57 = vpack.c.bf16 %v3537_v41, %v3545_v45  ;;  %v2790_v58 = vpack.c.bf16 %v3539_v42, %v3547_v46  ;;  %v2784_v59 = vpack.c.bf16 %v3541_v43, %v3549_v47  ;;  %v2792_v60 = vpack.c.bf16 %v3543_v44, %v3551_v48 }
  0xa8   : > { %v486_v9 = vpop.permute.xlu1 %485 }
  0xa9   : > { %2783 = vmatprep.subr.bf16.mxu0 %v2782_v57  ;;  %2791 = vmatprep.subr.bf16.mxu1 %v2790_v58  ;;  %v3564_v5 = vadd.f32 %v486_v9, %v461_v13  ;;  %v3566_v52 = vadd.f32 %v486_v9, %v462_v14  ;;  %v3568_v62 = vadd.f32 %v486_v9, %v463_v15 }
  0xaa   : > { %2785 = vmatpush1.bf16.msra.mxu0 %v2784_v59  ;;  %2793 = vmatpush1.bf16.msra.mxu1 %v2792_v60  ;;  %v3570_v63 = vadd.f32 %v486_v9, %v464_v16  ;;  %v530_v60 = vpop.permute.xlu0 %529 }
  0xac   : > { %v491_v0 = vpop.permute.xlu1 %490 }
  0xad   : > { %v3572_v1 = vadd.f32 %v491_v0, %v465_v18  ;;  %v3574_v3 = vadd.f32 %v491_v0, %v466_v19  ;;  %v3576_v6 = vadd.f32 %v491_v0, %v467_v4  ;;  %v3578_v21 = vadd.f32 %v491_v0, %v468_v20 }
  0xaf   : > { %v2786_v22 = vpack.c.bf16 %v3574_v3, %v3566_v52  ;;  %v2794_v23 = vpack.c.bf16 %v3578_v21, %v3570_v63  ;;  %v2788_v24 = vpack.c.bf16 %v3572_v1, %v3564_v5  ;;  %v2796_v25 = vpack.c.bf16 %v3576_v6, %v3568_v62 }
  0xb0   : > { %v525_v39 = vpop.permute.xlu1 %524 }
  0xb1   : > { %2787 = vmatprep.subr.bf16.mxu0 %v2786_v22  ;;  %2795 = vmatprep.subr.bf16.mxu1 %v2794_v23 }
  0xb2   : > { %2789 = vmatpush1.bf16.msra.mxu0 %v2788_v24  ;;  %2797 = vmatpush1.bf16.msra.mxu1 %v2796_v25 }
  0xb4   : > { %v535_v13 = vpop.permute.xlu1 %534 }
  0xb5   : > { %2664 = vmatmul.mubr.msk.f32.vlgmr.msra.gmra.mrb[0].mxu0 %vm537_vm0, %v509_v26  ;;  %2668 = vmatmul.mubr.msk.f32.vlgmr.msra.gmra.mrb[0].mxu1 %vm537_vm0, %v509_v26 }
  0xb6   : > { %620 = vmatprep.mubr.f32.mxu0 %v3281_v17  ;;  %709 = vmatprep.mubr.f32.mxu1 %v3281_v17 }
  0xb9   : > { %2665 = vmatmul.mubr.msk.f32.gmra.mrb[2].mxu0 %vm537_vm0, %v510_v27  ;;  %2669 = vmatmul.mubr.msk.f32.gmra.mrb[2].mxu1 %vm537_vm0, %v510_v27 }
  0xba   : > { %626 = vmatprep.mubr.f32.mxu0 %v3281_v17  ;;  %715 = vmatprep.mubr.f32.mxu1 %v3281_v17 }
  0xbd   : > { %2666 = vmatmul.mubr.msk.f32.gmra.mrb[4].mxu0 %vm537_vm0, %v511_v28  ;;  %2670 = vmatmul.mubr.msk.f32.gmra.mrb[4].mxu1 %vm537_vm0, %v511_v28 }
  0xbe   : > { %632 = vmatprep.mubr.f32.mxu0 %v3281_v17  ;;  %721 = vmatprep.mubr.f32.mxu1 %v3281_v17 }
  0xc1   : > { %2667 = vmatmul.mubr.msk.f32.gmra.mrb[6].mxu0 %vm537_vm0, %v512_v29  ;;  %2671 = vmatmul.mubr.msk.f32.gmra.mrb[6].mxu1 %vm537_vm0, %v512_v29 }
  0xc2   : > { %848 = vmatprep.mubr.f32.mxu0 %v3281_v17  ;;  %937 = vmatprep.mubr.f32.mxu1 %v3281_v17 }
 0x188   : > { %v616_v31 = vpop.f32.mrb[0].mxu0  ;;  %v705_v32 = vpop.f32.mrb[0].mxu1 }
 0x189   : > { %v617_v33 = vadd.f32 %v616_v31, %v520_v30  ;;  %v706_v34 = vadd.f32 %v705_v32, %v520_v30  ;;  %v618_v35 = vpop.f32.mrb[1].mxu0  ;;  %v707_v36 = vpop.f32.mrb[1].mxu1 }
 0x18a   : > { %v619_v37 = vadd.f32 %v618_v35, %v520_v30  ;;  %v708_v38 = vadd.f32 %v707_v36, %v520_v30 }
 0x18b   : > { %2959 = vtanh.f32 %v617_v33 }
 0x18c   : > { %2961 = vtanh.f32 %v706_v34  ;;  %v622_v40 = vpop.f32.mrb[2].mxu0  ;;  %v711_v51 = vpop.f32.mrb[2].mxu1 }
 0x18d   : > { %2963 = vtanh.f32 %v619_v37  ;;  %v623_v54 = vadd.f32 %v622_v40, %v525_v39  ;;  %v712_v55 = vadd.f32 %v711_v51, %v525_v39  ;;  %v624_v56 = vpop.f32.mrb[3].mxu0  ;;  %v713_v57 = vpop.f32.mrb[3].mxu1 }
 0x18e   : > { %2965 = vtanh.f32 %v708_v38  ;;  %v625_v58 = vadd.f32 %v624_v56, %v525_v39  ;;  %v714_v59 = vadd.f32 %v713_v57, %v525_v39 }
 0x18f   : > { %2967 = vtanh.f32 %v623_v54 }
 0x190   : > { %2969 = vtanh.f32 %v712_v55  ;;  %v628_v2 = vpop.f32.mrb[4].mxu0  ;;  %v717_v7 = vpop.f32.mrb[4].mxu1 }
 0x191   : > { %2971 = vtanh.f32 %v625_v58  ;;  %v629_v61 = vadd.f32 %v628_v2, %v530_v60  ;;  %v718_v8 = vadd.f32 %v717_v7, %v530_v60  ;;  %v630_v9 = vpop.f32.mrb[5].mxu0  ;;  %v719_v10 = vpop.f32.mrb[5].mxu1  ;;  %v744_v58 = vld [vmem:[%s4073_s5] sm:$0xff]  ;;  %v747_v2 = vld [vmem:[%s4073_s5 + $0x18] sm:$0xff] }
 0x192   : > { %2973 = vtanh.f32 %v714_v59  ;;  %v631_v11 = vadd.f32 %v630_v9, %v530_v60  ;;  %v720_v12 = vadd.f32 %v719_v10, %v530_v60  ;;  %v745_v59 = vld [vmem:[%s4073_s5 + $0x8] sm:$0xff]  ;;  %v746_v60 = vld [vmem:[%s4073_s5 + $0x10] sm:$0xff]  ;;  %v755_v7 = vpop.permute.xlu0 %754 }
 0x193   : > { %2975 = vtanh.f32 %v629_v61 }
 0x194   : > { %2977 = vtanh.f32 %v718_v8  ;;  %v634_v14 = vpop.f32.mrb[6].mxu0  ;;  %v723_v15 = vpop.f32.mrb[6].mxu1 }
 0x195   : > { %v2960_v16 = vpop.eup %2959  ;;  %2979 = vtanh.f32 %v631_v11  ;;  %v635_v18 = vadd.f32 %v634_v14, %v535_v13  ;;  %v724_v19 = vadd.f32 %v723_v15, %v535_v13  ;;  %v636_v4 = vpop.f32.mrb[7].mxu0 }
 0x196   : > { %v725_v20 = vpop.f32.mrb[7].mxu1  ;;  %v2962_v0 = vpop.eup %2961  ;;  %2981 = vtanh.f32 %v720_v12  ;;  %v637_v22 = vadd.f32 %v636_v4, %v535_v13 }
 0x197   : > { %v726_v23 = vadd.f32 %v725_v20, %v535_v13  ;;  %v2964_v24 = vpop.eup %2963  ;;  %2983 = vtanh.f32 %v635_v18  ;;  %v760_v15 = vpop.permute.xlu1 %759 }
 0x198   : > { %v2966_v25 = vpop.eup %2965  ;;  %2985 = vtanh.f32 %v724_v19 }
 0x199   : > { %v2968_v26 = vpop.eup %2967  ;;  %2987 = vtanh.f32 %v637_v22 }
 0x19a   : > { %v2970_v27 = vpop.eup %2969  ;;  %2989 = vtanh.f32 %v726_v23  ;;  %v2800_v28 = vpack.c.bf16 %v2968_v26, %v2960_v16 }
 0x19b   : > { %v2972_v29 = vpop.eup %2971  ;;  %v2808_v30 = vpack.c.bf16 %v2970_v27, %v2962_v0 }
 0x19c   : > { %v2974_v31 = vpop.eup %2973  ;;  %v2798_v32 = vpack.c.bf16 %v2972_v29, %v2964_v24  ;;  %v765_v24 = vpop.permute.xlu0 %764 }
 0x19d   : > { %v2976_v33 = vpop.eup %2975  ;;  %v2806_v34 = vpack.c.bf16 %v2974_v31, %v2966_v25 }
 0x19e   : > { %v2978_v35 = vpop.eup %2977  ;;  %2799 = vmatprep.subr.bf16.mxu0 %v2798_v32 }
 0x19f   : > { %v2980_v36 = vpop.eup %2979  ;;  %2807 = vmatprep.subr.bf16.mxu1 %v2806_v34  ;;  %2801 = vmatpush1.bf16.msra.mxu0 %v2800_v28 }
 0x1a0   : > { %v2982_v37 = vpop.eup %2981  ;;  %2809 = vmatpush1.bf16.msra.mxu1 %v2808_v30 }
 0x1a1   : > { %v2984_v38 = vpop.eup %2983 }
 0x1a2   : > { %v2986_v39 = vpop.eup %2985  ;;  %v2804_v40 = vpack.c.bf16 %v2984_v38, %v2976_v33  ;;  %v770_v33 = vpop.permute.xlu1 %769 }
 0x1a3   : > { %v2988_v51 = vpop.eup %2987  ;;  %v2812_v54 = vpack.c.bf16 %v2986_v39, %v2978_v35 }
 0x1a4   : > { %v2990_v55 = vpop.eup %2989  ;;  %v2802_v56 = vpack.c.bf16 %v2988_v51, %v2980_v36 }
 0x1a5   : > { %v2810_v57 = vpack.c.bf16 %v2990_v55, %v2982_v37 }
 0x1a6   : > { %2803 = vmatprep.subr.bf16.mxu0 %v2802_v56 }
 0x1a7   : > { %2811 = vmatprep.subr.bf16.mxu1 %v2810_v57  ;;  %2805 = vmatpush1.bf16.msra.mxu0 %v2804_v40 }
 0x1a8   : > { %2813 = vmatpush1.bf16.msra.mxu1 %v2812_v54 }
 0x1aa   : > { %2672 = vmatmul.mubr.msk.f32.vlgmr.msra.gmra.mrb[8].mxu0 %vm537_vm0, %v744_v58 }
 0x1ab   : > { %2676 = vmatmul.mubr.msk.f32.vlgmr.msra.gmra.mrb[8].mxu1 %vm537_vm0, %v744_v58  ;;  %854 = vmatprep.mubr.f32.mxu0 %v3281_v17 }
 0x1ac   : > { %943 = vmatprep.mubr.f32.mxu1 %v3281_v17 }
 0x1ae   : > { %2673 = vmatmul.mubr.msk.f32.gmra.mrb[10].mxu0 %vm537_vm0, %v745_v59 }
 0x1af   : > { %2677 = vmatmul.mubr.msk.f32.gmra.mrb[10].mxu1 %vm537_vm0, %v745_v59  ;;  %860 = vmatprep.mubr.f32.mxu0 %v3281_v17 }
 0x1b0   : > { %949 = vmatprep.mubr.f32.mxu1 %v3281_v17 }
 0x1b2   : > { %2674 = vmatmul.mubr.msk.f32.gmra.mrb[12].mxu0 %vm537_vm0, %v746_v60 }
 0x1b3   : > { %2678 = vmatmul.mubr.msk.f32.gmra.mrb[12].mxu1 %vm537_vm0, %v746_v60  ;;  %866 = vmatprep.mubr.f32.mxu0 %v3281_v17 }
 0x1b4   : > { %955 = vmatprep.mubr.f32.mxu1 %v3281_v17 }
 0x1b6   : > { %2675 = vmatmul.mubr.msk.f32.gmra.mrb[14].mxu0 %vm537_vm0, %v747_v2 }
 0x1b7   : > { %2679 = vmatmul.mubr.msk.f32.gmra.mrb[14].mxu1 %vm537_vm0, %v747_v2  ;;  %1100 = vmatprep.mubr.f32.mxu0 %v3281_v17 }
 0x1b8   : > { %1189 = vmatprep.mubr.f32.mxu1 %v3281_v17 }
 0x27d   : > { %v850_v61 = vpop.f32.mrb[8].mxu0 }
 0x27e   : > { %v851_v8 = vadd.f32 %v850_v61, %v755_v7  ;;  %v939_v9 = vpop.f32.mrb[8].mxu1  ;;  %v852_v10 = vpop.f32.mrb[9].mxu0 }
 0x27f   : > { %v940_v11 = vadd.f32 %v939_v9, %v755_v7  ;;  %v853_v12 = vadd.f32 %v852_v10, %v755_v7  ;;  %v941_v13 = vpop.f32.mrb[9].mxu1 }
 0x280   : > { %2991 = vtanh.f32 %v851_v8  ;;  %v942_v14 = vadd.f32 %v941_v13, %v755_v7 }
 0x281   : > { %2993 = vtanh.f32 %v940_v11  ;;  %v856_v16 = vpop.f32.mrb[10].mxu0 }
 0x282   : > { %2995 = vtanh.f32 %v853_v12  ;;  %v857_v18 = vadd.f32 %v856_v16, %v760_v15  ;;  %v945_v19 = vpop.f32.mrb[10].mxu1  ;;  %v858_v4 = vpop.f32.mrb[11].mxu0 }
 0x283   : > { %2997 = vtanh.f32 %v942_v14  ;;  %v946_v20 = vadd.f32 %v945_v19, %v760_v15  ;;  %v859_v0 = vadd.f32 %v858_v4, %v760_v15  ;;  %v947_v22 = vpop.f32.mrb[11].mxu1 }
 0x284   : > { %2999 = vtanh.f32 %v857_v18  ;;  %v948_v23 = vadd.f32 %v947_v22, %v760_v15 }
 0x285   : > { %3001 = vtanh.f32 %v946_v20  ;;  %v862_v25 = vpop.f32.mrb[12].mxu0 }
 0x286   : > { %3003 = vtanh.f32 %v859_v0  ;;  %v863_v26 = vadd.f32 %v862_v25, %v765_v24  ;;  %v951_v27 = vpop.f32.mrb[12].mxu1  ;;  %v864_v28 = vpop.f32.mrb[13].mxu0  ;;  %v2683_v25 = vld [vmem:[%s4071_s3 + $0x38] sm:$0xff] }
 0x287   : > { %3005 = vtanh.f32 %v948_v23  ;;  %v952_v29 = vadd.f32 %v951_v27, %v765_v24  ;;  %v865_v30 = vadd.f32 %v864_v28, %v765_v24  ;;  %v953_v31 = vpop.f32.mrb[13].mxu1 }
 0x288   : > { %3007 = vtanh.f32 %v863_v26  ;;  %v954_v32 = vadd.f32 %v953_v31, %v765_v24  ;;  %v1007_v26 = vpop.permute.xlu0 %1006 }
 0x289   : > { %3009 = vtanh.f32 %v952_v29  ;;  %v868_v34 = vpop.f32.mrb[14].mxu0 }
 0x28a   : > { %v2992_v35 = vpop.eup %2991  ;;  %3011 = vtanh.f32 %v865_v30  ;;  %v869_v36 = vadd.f32 %v868_v34, %v770_v33  ;;  %v957_v37 = vpop.f32.mrb[14].mxu1 }
 0x28b   : > { %v870_v38 = vpop.f32.mrb[15].mxu0  ;;  %v2994_v39 = vpop.eup %2993  ;;  %3013 = vtanh.f32 %v954_v32  ;;  %v958_v40 = vadd.f32 %v957_v37, %v770_v33 }
 0x28c   : > { %v871_v51 = vadd.f32 %v870_v38, %v770_v33  ;;  %v959_v54 = vpop.f32.mrb[15].mxu1  ;;  %v2996_v55 = vpop.eup %2995  ;;  %3015 = vtanh.f32 %v869_v36 }
 0x28d   : > { %v960_v56 = vadd.f32 %v959_v54, %v770_v33  ;;  %v2998_v57 = vpop.eup %2997  ;;  %3017 = vtanh.f32 %v958_v40  ;;  %v3648_v61 = vadd.f32 %v2996_v55, %v3545_v45 }
 0x28e   : > { %v3000_v58 = vpop.eup %2999  ;;  %3019 = vtanh.f32 %v871_v51  ;;  %v3657_v11 = vadd.f32 %v2998_v57, %v3547_v46 }
 0x28f   : > { %v3002_v59 = vpop.eup %3001  ;;  %3021 = vtanh.f32 %v960_v56  ;;  %v3645_v2 = vadd.f32 %v3000_v58, %v3541_v43  ;;  %v3663_v43 = vadd.f32 %v2992_v35, %v3549_v47  ;;  %v1012_v35 = vpop.permute.xlu1 %1011 }
 0x290   : > { %v3004_v60 = vpop.eup %3003  ;;  %v3654_v9 = vadd.f32 %v3002_v59, %v3543_v44  ;;  %v1017_v56 = vpop.permute.xlu0 %1016 }
 0x291   : > { %v3006_v7 = vpop.eup %3005  ;;  %v3651_v8 = vadd.f32 %v3004_v60, %v3537_v41  ;;  %v3668_v41 = vadd.f32 %v2994_v39, %v3551_v48  ;;  %v2816_v46 = vpack.c.bf16 %v3645_v2, %v3663_v43 }
 0x292   : > { %v3008_v10 = vpop.eup %3007  ;;  %v3660_v12 = vadd.f32 %v3006_v7, %v3539_v42 }
 0x293   : > { %v3010_v13 = vpop.eup %3009  ;;  %v2814_v45 = vpack.c.bf16 %v3651_v8, %v3648_v61  ;;  %v2824_v42 = vpack.c.bf16 %v3654_v9, %v3668_v41  ;;  %v3695_v24 = vadd.f32 %v3008_v10, %v3564_v5  ;;  %v2680_v5 = vld [vmem:[%s4071_s3 + $0x20] sm:$0xff] }
 0x294   : > { %v3012_v14 = vpop.eup %3011  ;;  %v2822_v44 = vpack.c.bf16 %v3660_v12, %v3657_v11 }
 0x295   : > { %v3014_v15 = vpop.eup %3013  ;;  %2815 = vmatprep.subr.bf16.mxu0 %v2814_v45  ;;  %v3680_v4 = vadd.f32 %v3012_v14, %v3566_v52  ;;  %v3700_v52 = vadd.f32 %v3010_v13, %v3568_v62  ;;  %v2681_v62 = vld [vmem:[%s4071_s3 + $0x28] sm:$0xff]  ;;  %v1022_v14 = vpop.permute.xlu1 %1021 }
 0x296   : > { %v3016_v47 = vpop.eup %3015  ;;  %2823 = vmatprep.subr.bf16.mxu1 %v2822_v44  ;;  %2817 = vmatpush1.bf16.msra.mxu0 %v2816_v46  ;;  %v3689_v22 = vadd.f32 %v3014_v15, %v3570_v63 }
 0x297   : > { %v3018_v16 = vpop.eup %3017  ;;  %2825 = vmatpush1.bf16.msra.mxu1 %v2824_v42  ;;  %v3677_v48 = vadd.f32 %v3016_v47, %v3572_v1 }
 0x298   : > { %v3020_v18 = vpop.eup %3019  ;;  %v3686_v0 = vadd.f32 %v3018_v16, %v3576_v6 }
 0x299   : > { %v3022_v19 = vpop.eup %3021  ;;  %v3683_v20 = vadd.f32 %v3020_v18, %v3574_v3  ;;  %v2820_v6 = vpack.c.bf16 %v3677_v48, %v3695_v24 }
 0x29a   : > { %v3692_v23 = vadd.f32 %v3022_v19, %v3578_v21  ;;  %v2828_v63 = vpack.c.bf16 %v3686_v0, %v3700_v52  ;;  %v2682_v21 = vld [vmem:[%s4071_s3 + $0x30] sm:$0xff] }
 0x29b   : > { %v2818_v1 = vpack.c.bf16 %v3683_v20, %v3680_v4 }
 0x29c   : > { %v2826_v3 = vpack.c.bf16 %v3692_v23, %v3689_v22 }
 0x29d   : > { %2819 = vmatprep.subr.bf16.mxu0 %v2818_v1 }
 0x29e   : > { %2827 = vmatprep.subr.bf16.mxu1 %v2826_v3  ;;  %2821 = vmatpush1.bf16.msra.mxu0 %v2820_v6 }
 0x29f   : > { %2829 = vmatpush1.bf16.msra.mxu1 %v2828_v63 }
 0x2a1   : > { %2688 = vmatmul.mubr.msk.f32.vlgmr.msra.gmra.mrb[16].mxu0 %vm537_vm0, %v2680_v5 }
 0x2a2   : > { %2692 = vmatmul.mubr.msk.f32.vlgmr.msra.gmra.mrb[16].mxu1 %vm537_vm0, %v2680_v5  ;;  %1106 = vmatprep.mubr.f32.mxu0 %v3281_v17 }
 0x2a3   : > { %1195 = vmatprep.mubr.f32.mxu1 %v3281_v17 }
 0x2a5   : > { %2689 = vmatmul.mubr.msk.f32.gmra.mrb[18].mxu0 %vm537_vm0, %v2681_v62 }
 0x2a6   : > { %2693 = vmatmul.mubr.msk.f32.gmra.mrb[18].mxu1 %vm537_vm0, %v2681_v62  ;;  %1112 = vmatprep.mubr.f32.mxu0 %v3281_v17 }
 0x2a7   : > { %1201 = vmatprep.mubr.f32.mxu1 %v3281_v17 }
 0x2a9   : > { %2690 = vmatmul.mubr.msk.f32.gmra.mrb[20].mxu0 %vm537_vm0, %v2682_v21 }
 0x2aa   : > { %2694 = vmatmul.mubr.msk.f32.gmra.mrb[20].mxu1 %vm537_vm0, %v2682_v21  ;;  %1118 = vmatprep.mubr.f32.mxu0 %v3281_v17 }
 0x2ab   : > { %1207 = vmatprep.mubr.f32.mxu1 %v3281_v17 }
 0x2ad   : > { %2691 = vmatmul.mubr.msk.f32.gmra.mrb[22].mxu0 %vm537_vm0, %v2683_v25 }
 0x2ae   : > { %2695 = vmatmul.mubr.msk.f32.gmra.mrb[22].mxu1 %vm537_vm0, %v2683_v25  ;;  %1336 = vmatprep.mubr.f32.mxu0 %v3281_v17 }
 0x2af   : > { %1425 = vmatprep.mubr.f32.mxu1 %v3281_v17 }
 0x374   : > { %v1102_v27 = vpop.f32.mrb[16].mxu0 }
 0x375   : > { %v1103_v28 = vadd.f32 %v1102_v27, %v1007_v26  ;;  %v1191_v29 = vpop.f32.mrb[16].mxu1  ;;  %v1104_v30 = vpop.f32.mrb[17].mxu0 }
 0x376   : > { %v1192_v31 = vadd.f32 %v1191_v29, %v1007_v26  ;;  %v1105_v32 = vadd.f32 %v1104_v30, %v1007_v26  ;;  %v1193_v33 = vpop.f32.mrb[17].mxu1 }
 0x377   : > { %3023 = vtanh.f32 %v1103_v28  ;;  %v1194_v34 = vadd.f32 %v1193_v33, %v1007_v26 }
 0x378   : > { %3025 = vtanh.f32 %v1192_v31  ;;  %v1108_v36 = vpop.f32.mrb[18].mxu0 }
 0x379   : > { %3027 = vtanh.f32 %v1105_v32  ;;  %v1109_v37 = vadd.f32 %v1108_v36, %v1012_v35  ;;  %v1197_v38 = vpop.f32.mrb[18].mxu1  ;;  %v1110_v39 = vpop.f32.mrb[19].mxu0 }
 0x37a   : > { %3029 = vtanh.f32 %v1194_v34  ;;  %v1198_v40 = vadd.f32 %v1197_v38, %v1012_v35  ;;  %v1111_v51 = vadd.f32 %v1110_v39, %v1012_v35  ;;  %v1199_v54 = vpop.f32.mrb[19].mxu1 }
 0x37b   : > { %3031 = vtanh.f32 %v1109_v37  ;;  %v1200_v55 = vadd.f32 %v1199_v54, %v1012_v35  ;;  %v2696_v54 = vld [vmem:[%s4073_s5 + $0x20] sm:$0xff] }
 0x37c   : > { %3033 = vtanh.f32 %v1198_v40  ;;  %v1114_v57 = vpop.f32.mrb[20].mxu0 }
 0x37d   : > { %3035 = vtanh.f32 %v1111_v51  ;;  %v1115_v58 = vadd.f32 %v1114_v57, %v1017_v56  ;;  %v1203_v59 = vpop.f32.mrb[20].mxu1  ;;  %v1116_v60 = vpop.f32.mrb[21].mxu0  ;;  %v2699_v57 = vld [vmem:[%s4073_s5 + $0x38] sm:$0xff] }
 0x37e   : > { %3037 = vtanh.f32 %v1200_v55  ;;  %v1204_v7 = vadd.f32 %v1203_v59, %v1017_v56  ;;  %v1117_v10 = vadd.f32 %v1116_v60, %v1017_v56  ;;  %v1205_v13 = vpop.f32.mrb[21].mxu1  ;;  %v2697_v55 = vld [vmem:[%s4073_s5 + $0x28] sm:$0xff] }
 0x37f   : > { %3039 = vtanh.f32 %v1115_v58  ;;  %v1206_v45 = vadd.f32 %v1205_v13, %v1017_v56  ;;  %v2698_v56 = vld [vmem:[%s4073_s5 + $0x30] sm:$0xff]  ;;  %v1243_v58 = vpop.permute.xlu0 %1242 }
 0x380   : > { %3041 = vtanh.f32 %v1204_v7  ;;  %v1120_v44 = vpop.f32.mrb[22].mxu0 }
 0x381   : > { %v3024_v46 = vpop.eup %3023  ;;  %3043 = vtanh.f32 %v1117_v10  ;;  %v1121_v15 = vadd.f32 %v1120_v44, %v1022_v14  ;;  %v1209_v42 = vpop.f32.mrb[22].mxu1 }
 0x382   : > { %v1122_v47 = vpop.f32.mrb[23].mxu0  ;;  %v3026_v16 = vpop.eup %3025  ;;  %3045 = vtanh.f32 %v1206_v45  ;;  %v1210_v18 = vadd.f32 %v1209_v42, %v1022_v14 }
 0x383   : > { %v1123_v19 = vadd.f32 %v1122_v47, %v1022_v14  ;;  %v1211_v1 = vpop.f32.mrb[23].mxu1  ;;  %v3028_v3 = vpop.eup %3027  ;;  %3047 = vtanh.f32 %v1121_v15 }
 0x384   : > { %v1212_v6 = vadd.f32 %v1211_v1, %v1022_v14  ;;  %v3030_v63 = vpop.eup %3029  ;;  %3049 = vtanh.f32 %v1210_v18 }
 0x385   : > { %v3032_v5 = vpop.eup %3031  ;;  %3051 = vtanh.f32 %v1123_v19 }
 0x386   : > { %v3034_v62 = vpop.eup %3033  ;;  %3053 = vtanh.f32 %v1212_v6  ;;  %v2832_v21 = vpack.c.bf16 %v3032_v5, %v3024_v46  ;;  %v1248_v46 = vpop.permute.xlu1 %1247 }
 0x387   : > { %v3036_v25 = vpop.eup %3035  ;;  %v2840_v26 = vpack.c.bf16 %v3034_v62, %v3026_v16  ;;  %v1253_v6 = vpop.permute.xlu0 %1252 }
 0x388   : > { %v3038_v27 = vpop.eup %3037  ;;  %v2830_v28 = vpack.c.bf16 %v3036_v25, %v3028_v3 }
 0x389   : > { %v3040_v29 = vpop.eup %3039  ;;  %v2838_v30 = vpack.c.bf16 %v3038_v27, %v3030_v63 }
 0x38a   : > { %v3042_v31 = vpop.eup %3041  ;;  %2831 = vmatprep.subr.bf16.mxu0 %v2830_v28 }
 0x38b   : > { %v3044_v32 = vpop.eup %3043  ;;  %2839 = vmatprep.subr.bf16.mxu1 %v2838_v30  ;;  %2833 = vmatpush1.bf16.msra.mxu0 %v2832_v21 }
 0x38c   : > { %v3046_v33 = vpop.eup %3045  ;;  %2841 = vmatpush1.bf16.msra.mxu1 %v2840_v26 }
 0x38d   : > { %v3048_v34 = vpop.eup %3047 }
 0x38e   : > { %v3050_v35 = vpop.eup %3049  ;;  %v2836_v36 = vpack.c.bf16 %v3048_v34, %v3040_v29  ;;  %v1258_v29 = vpop.permute.xlu1 %1257 }
 0x38f   : > { %v3052_v37 = vpop.eup %3051  ;;  %v2844_v38 = vpack.c.bf16 %v3050_v35, %v3042_v31 }
 0x390   : > { %v3054_v39 = vpop.eup %3053  ;;  %v2834_v40 = vpack.c.bf16 %v3052_v37, %v3044_v32 }
 0x391   : > { %v2842_v51 = vpack.c.bf16 %v3054_v39, %v3046_v33 }
 0x392   : > { %2835 = vmatprep.subr.bf16.mxu0 %v2834_v40 }
 0x393   : > { %2843 = vmatprep.subr.bf16.mxu1 %v2842_v51  ;;  %2837 = vmatpush1.bf16.msra.mxu0 %v2836_v36 }
 0x394   : > { %2845 = vmatpush1.bf16.msra.mxu1 %v2844_v38 }
 0x396   : > { %2704 = vmatmul.mubr.msk.f32.vlgmr.msra.gmra.mrb[24].mxu0 %vm537_vm0, %v2696_v54 }
 0x397   : > { %2708 = vmatmul.mubr.msk.f32.vlgmr.msra.gmra.mrb[24].mxu1 %vm537_vm0, %v2696_v54  ;;  %1342 = vmatprep.mubr.f32.mxu0 %v3281_v17 }
 0x398   : > { %1431 = vmatprep.mubr.f32.mxu1 %v3281_v17 }
 0x39a   : > { %2705 = vmatmul.mubr.msk.f32.gmra.mrb[26].mxu0 %vm537_vm0, %v2697_v55 }
 0x39b   : > { %2709 = vmatmul.mubr.msk.f32.gmra.mrb[26].mxu1 %vm537_vm0, %v2697_v55  ;;  %1348 = vmatprep.mubr.f32.mxu0 %v3281_v17 }
 0x39c   : > { %1437 = vmatprep.mubr.f32.mxu1 %v3281_v17 }
 0x39e   : > { %2706 = vmatmul.mubr.msk.f32.gmra.mrb[28].mxu0 %vm537_vm0, %v2698_v56 }
 0x39f   : > { %2710 = vmatmul.mubr.msk.f32.gmra.mrb[28].mxu1 %vm537_vm0, %v2698_v56  ;;  %1354 = vmatprep.mubr.f32.mxu0 %v3281_v17 }
 0x3a0   : > { %1443 = vmatprep.mubr.f32.mxu1 %v3281_v17 }
 0x3a2   : > { %2707 = vmatmul.mubr.msk.f32.gmra.mrb[30].mxu0 %vm537_vm0, %v2699_v57 }
 0x3a3   : > { %2711 = vmatmul.mubr.msk.f32.gmra.mrb[30].mxu1 %vm537_vm0, %v2699_v57  ;;  %1588 = vmatprep.mubr.f32.mxu0 %v3281_v17 }
 0x3a4   : > { %1677 = vmatprep.mubr.f32.mxu1 %v3281_v17 }
 0x469   : > { %v1338_v59 = vpop.f32.mrb[24].mxu0 }
 0x46a   : > { %v1339_v60 = vadd.f32 %v1338_v59, %v1243_v58  ;;  %v1427_v7 = vpop.f32.mrb[24].mxu1  ;;  %v1340_v10 = vpop.f32.mrb[25].mxu0 }
 0x46b   : > { %v1428_v13 = vadd.f32 %v1427_v7, %v1243_v58  ;;  %v1341_v45 = vadd.f32 %v1340_v10, %v1243_v58  ;;  %v1429_v14 = vpop.f32.mrb[25].mxu1 }
 0x46c   : > { %3055 = vtanh.f32 %v1339_v60  ;;  %v1430_v44 = vadd.f32 %v1429_v14, %v1243_v58 }
 0x46d   : > { %3057 = vtanh.f32 %v1428_v13  ;;  %v1344_v15 = vpop.f32.mrb[26].mxu0 }
 0x46e   : > { %3059 = vtanh.f32 %v1341_v45  ;;  %v1345_v42 = vadd.f32 %v1344_v15, %v1248_v46  ;;  %v1433_v47 = vpop.f32.mrb[26].mxu1  ;;  %v1346_v16 = vpop.f32.mrb[27].mxu0 }
 0x46f   : > { %3061 = vtanh.f32 %v1430_v44  ;;  %v1434_v18 = vadd.f32 %v1433_v47, %v1248_v46  ;;  %v1347_v19 = vadd.f32 %v1346_v16, %v1248_v46  ;;  %v1435_v1 = vpop.f32.mrb[27].mxu1 }
 0x470   : > { %3063 = vtanh.f32 %v1345_v42  ;;  %v1436_v3 = vadd.f32 %v1435_v1, %v1248_v46 }
 0x471   : > { %3065 = vtanh.f32 %v1434_v18  ;;  %v1350_v63 = vpop.f32.mrb[28].mxu0 }
 0x472   : > { %3067 = vtanh.f32 %v1347_v19  ;;  %v1351_v5 = vadd.f32 %v1350_v63, %v1253_v6  ;;  %v1439_v62 = vpop.f32.mrb[28].mxu1  ;;  %v1352_v21 = vpop.f32.mrb[29].mxu0  ;;  %v2715_v63 = vld [vmem:[%s4071_s3 + $0x58] sm:$0xff] }
 0x473   : > { %3069 = vtanh.f32 %v1436_v3  ;;  %v1440_v25 = vadd.f32 %v1439_v62, %v1253_v6  ;;  %v1353_v26 = vadd.f32 %v1352_v21, %v1253_v6  ;;  %v1441_v27 = vpop.f32.mrb[29].mxu1 }
 0x474   : > { %3071 = vtanh.f32 %v1351_v5  ;;  %v1442_v28 = vadd.f32 %v1441_v27, %v1253_v6  ;;  %v1495_v5 = vpop.permute.xlu0 %1494 }
 0x475   : > { %3073 = vtanh.f32 %v1440_v25  ;;  %v1356_v30 = vpop.f32.mrb[30].mxu0 }
 0x476   : > { %v3056_v31 = vpop.eup %3055  ;;  %3075 = vtanh.f32 %v1353_v26  ;;  %v1357_v32 = vadd.f32 %v1356_v30, %v1258_v29  ;;  %v1445_v33 = vpop.f32.mrb[30].mxu1 }
 0x477   : > { %v1358_v34 = vpop.f32.mrb[31].mxu0  ;;  %v3058_v35 = vpop.eup %3057  ;;  %3077 = vtanh.f32 %v1442_v28  ;;  %v1446_v36 = vadd.f32 %v1445_v33, %v1258_v29 }
 0x478   : > { %v1359_v37 = vadd.f32 %v1358_v34, %v1258_v29  ;;  %v1447_v38 = vpop.f32.mrb[31].mxu1  ;;  %v3060_v39 = vpop.eup %3059  ;;  %3079 = vtanh.f32 %v1357_v32 }
 0x479   : > { %v1448_v40 = vadd.f32 %v1447_v38, %v1258_v29  ;;  %v3062_v51 = vpop.eup %3061  ;;  %3081 = vtanh.f32 %v1446_v36  ;;  %v3768_v59 = vadd.f32 %v3060_v39, %v3648_v61 }
 0x47a   : > { %v3064_v54 = vpop.eup %3063  ;;  %3083 = vtanh.f32 %v1359_v37  ;;  %v3777_v13 = vadd.f32 %v3062_v51, %v3657_v11 }
 0x47b   : > { %v3066_v55 = vpop.eup %3065  ;;  %3085 = vtanh.f32 %v1448_v40  ;;  %v3765_v57 = vadd.f32 %v3064_v54, %v3645_v2  ;;  %v3783_v2 = vadd.f32 %v3056_v31, %v3663_v43  ;;  %v1500_v31 = vpop.permute.xlu1 %1499 }
 0x47c   : > { %v3068_v56 = vpop.eup %3067  ;;  %v3774_v7 = vadd.f32 %v3066_v55, %v3654_v9  ;;  %v1505_v40 = vpop.permute.xlu0 %1504 }
 0x47d   : > { %v3070_v58 = vpop.eup %3069  ;;  %v3771_v60 = vadd.f32 %v3068_v56, %v3651_v8  ;;  %v3788_v8 = vadd.f32 %v3058_v35, %v3668_v41  ;;  %v2848_v11 = vpack.c.bf16 %v3765_v57, %v3783_v2 }
 0x47e   : > { %v3072_v10 = vpop.eup %3071  ;;  %v3780_v45 = vadd.f32 %v3070_v58, %v3660_v12 }
 0x47f   : > { %v3074_v14 = vpop.eup %3073  ;;  %v2846_v61 = vpack.c.bf16 %v3771_v60, %v3768_v59  ;;  %v2856_v12 = vpack.c.bf16 %v3774_v7, %v3788_v8  ;;  %v3815_v6 = vadd.f32 %v3072_v10, %v3695_v24  ;;  %v2713_v24 = vld [vmem:[%s4071_s3 + $0x48] sm:$0xff] }
 0x480   : > { %v3076_v44 = vpop.eup %3075  ;;  %v2854_v9 = vpack.c.bf16 %v3780_v45, %v3777_v13 }
 0x481   : > { %v3078_v46 = vpop.eup %3077  ;;  %2847 = vmatprep.subr.bf16.mxu0 %v2846_v61  ;;  %v3800_v16 = vadd.f32 %v3076_v44, %v3680_v4  ;;  %v3820_v4 = vadd.f32 %v3074_v14, %v3700_v52  ;;  %v2714_v52 = vld [vmem:[%s4071_s3 + $0x50] sm:$0xff]  ;;  %v1510_v44 = vpop.permute.xlu1 %1509 }
 0x482   : > { %v3080_v43 = vpop.eup %3079  ;;  %2855 = vmatprep.subr.bf16.mxu1 %v2854_v9  ;;  %2849 = vmatpush1.bf16.msra.mxu0 %v2848_v11  ;;  %v3809_v1 = vadd.f32 %v3078_v46, %v3689_v22 }
 0x483   : > { %v3082_v15 = vpop.eup %3081  ;;  %2857 = vmatpush1.bf16.msra.mxu1 %v2856_v12  ;;  %v3797_v41 = vadd.f32 %v3080_v43, %v3677_v48 }
 0x484   : > { %v3084_v42 = vpop.eup %3083  ;;  %v3806_v19 = vadd.f32 %v3082_v15, %v3686_v0 }
 0x485   : > { %v3086_v47 = vpop.eup %3085  ;;  %v3803_v18 = vadd.f32 %v3084_v42, %v3683_v20  ;;  %v2852_v0 = vpack.c.bf16 %v3797_v41, %v3815_v6 }
 0x486   : > { %v3812_v3 = vadd.f32 %v3086_v47, %v3692_v23  ;;  %v2860_v22 = vpack.c.bf16 %v3806_v19, %v3820_v4  ;;  %v2712_v23 = vld [vmem:[%s4071_s3 + $0x40] sm:$0xff] }
 0x487   : > { %v2850_v48 = vpack.c.bf16 %v3803_v18, %v3800_v16 }
 0x488   : > { %v2858_v20 = vpack.c.bf16 %v3812_v3, %v3809_v1 }
 0x489   : > { %2851 = vmatprep.subr.bf16.mxu0 %v2850_v48 }
 0x48a   : > { %2859 = vmatprep.subr.bf16.mxu1 %v2858_v20  ;;  %2853 = vmatpush1.bf16.msra.mxu0 %v2852_v0 }
 0x48b   : > { %2861 = vmatpush1.bf16.msra.mxu1 %v2860_v22 }
 0x48d   : > { %2720 = vmatmul.mubr.msk.f32.vlgmr.msra.gmra.mrb[32].mxu0 %vm537_vm0, %v2712_v23 }
 0x48e   : > { %2724 = vmatmul.mubr.msk.f32.vlgmr.msra.gmra.mrb[32].mxu1 %vm537_vm0, %v2712_v23  ;;  %1594 = vmatprep.mubr.f32.mxu0 %v3281_v17 }
 0x48f   : > { %1683 = vmatprep.mubr.f32.mxu1 %v3281_v17 }
 0x491   : > { %2721 = vmatmul.mubr.msk.f32.gmra.mrb[34].mxu0 %vm537_vm0, %v2713_v24 }
 0x492   : > { %2725 = vmatmul.mubr.msk.f32.gmra.mrb[34].mxu1 %vm537_vm0, %v2713_v24  ;;  %1600 = vmatprep.mubr.f32.mxu0 %v3281_v17 }
 0x493   : > { %1689 = vmatprep.mubr.f32.mxu1 %v3281_v17 }
 0x495   : > { %2722 = vmatmul.mubr.msk.f32.gmra.mrb[36].mxu0 %vm537_vm0, %v2714_v52 }
 0x496   : > { %2726 = vmatmul.mubr.msk.f32.gmra.mrb[36].mxu1 %vm537_vm0, %v2714_v52  ;;  %1606 = vmatprep.mubr.f32.mxu0 %v3281_v17 }
 0x497   : > { %1695 = vmatprep.mubr.f32.mxu1 %v3281_v17 }
 0x499   : > { %2723 = vmatmul.mubr.msk.f32.gmra.mrb[38].mxu0 %vm537_vm0, %v2715_v63 }
 0x49a   : > { %2727 = vmatmul.mubr.msk.f32.gmra.mrb[38].mxu1 %vm537_vm0, %v2715_v63  ;;  %1824 = vmatprep.mubr.f32.mxu0 %v3281_v17 }
 0x49b   : > { %1913 = vmatprep.mubr.f32.mxu1 %v3281_v17 }
 0x560   : > { %v1590_v62 = vpop.f32.mrb[32].mxu0 }
 0x561   : > { %v1591_v21 = vadd.f32 %v1590_v62, %v1495_v5  ;;  %v1679_v25 = vpop.f32.mrb[32].mxu1  ;;  %v1592_v26 = vpop.f32.mrb[33].mxu0 }
 0x562   : > { %v1680_v27 = vadd.f32 %v1679_v25, %v1495_v5  ;;  %v1593_v28 = vadd.f32 %v1592_v26, %v1495_v5  ;;  %v1681_v29 = vpop.f32.mrb[33].mxu1 }
 0x563   : > { %3087 = vtanh.f32 %v1591_v21  ;;  %v1682_v30 = vadd.f32 %v1681_v29, %v1495_v5 }
 0x564   : > { %3089 = vtanh.f32 %v1680_v27  ;;  %v1596_v32 = vpop.f32.mrb[34].mxu0 }
 0x565   : > { %3091 = vtanh.f32 %v1593_v28  ;;  %v1597_v33 = vadd.f32 %v1596_v32, %v1500_v31  ;;  %v1685_v34 = vpop.f32.mrb[34].mxu1  ;;  %v1598_v35 = vpop.f32.mrb[35].mxu0 }
 0x566   : > { %3093 = vtanh.f32 %v1682_v30  ;;  %v1686_v36 = vadd.f32 %v1685_v34, %v1500_v31  ;;  %v1599_v37 = vadd.f32 %v1598_v35, %v1500_v31  ;;  %v1687_v38 = vpop.f32.mrb[35].mxu1 }
 0x567   : > { %3095 = vtanh.f32 %v1597_v33  ;;  %v1688_v39 = vadd.f32 %v1687_v38, %v1500_v31  ;;  %v2728_v38 = vld [vmem:[%s4073_s5 + $0x40] sm:$0xff] }
 0x568   : > { %3097 = vtanh.f32 %v1686_v36  ;;  %v1602_v51 = vpop.f32.mrb[36].mxu0 }
 0x569   : > { %3099 = vtanh.f32 %v1599_v37  ;;  %v1603_v54 = vadd.f32 %v1602_v51, %v1505_v40  ;;  %v1691_v55 = vpop.f32.mrb[36].mxu1  ;;  %v1604_v56 = vpop.f32.mrb[37].mxu0  ;;  %v2731_v51 = vld [vmem:[%s4073_s5 + $0x58] sm:$0xff] }
 0x56a   : > { %3101 = vtanh.f32 %v1688_v39  ;;  %v1692_v58 = vadd.f32 %v1691_v55, %v1505_v40  ;;  %v1605_v10 = vadd.f32 %v1604_v56, %v1505_v40  ;;  %v1693_v14 = vpop.f32.mrb[37].mxu1  ;;  %v2729_v39 = vld [vmem:[%s4073_s5 + $0x48] sm:$0xff] }
 0x56b   : > { %3103 = vtanh.f32 %v1603_v54  ;;  %v1694_v61 = vadd.f32 %v1693_v14, %v1505_v40  ;;  %v2730_v40 = vld [vmem:[%s4073_s5 + $0x50] sm:$0xff]  ;;  %v1731_v54 = vpop.permute.xlu0 %1730 }
 0x56c   : > { %3105 = vtanh.f32 %v1692_v58  ;;  %v1608_v9 = vpop.f32.mrb[38].mxu0 }
 0x56d   : > { %v3088_v11 = vpop.eup %3087  ;;  %3107 = vtanh.f32 %v1605_v10  ;;  %v1609_v46 = vadd.f32 %v1608_v9, %v1510_v44  ;;  %v1697_v12 = vpop.f32.mrb[38].mxu1 }
 0x56e   : > { %v1610_v43 = vpop.f32.mrb[39].mxu0  ;;  %v3090_v15 = vpop.eup %3089  ;;  %3109 = vtanh.f32 %v1694_v61  ;;  %v1698_v42 = vadd.f32 %v1697_v12, %v1510_v44 }
 0x56f   : > { %v1611_v47 = vadd.f32 %v1610_v43, %v1510_v44  ;;  %v1699_v48 = vpop.f32.mrb[39].mxu1  ;;  %v3092_v20 = vpop.eup %3091  ;;  %3111 = vtanh.f32 %v1609_v46 }
 0x570   : > { %v1700_v0 = vadd.f32 %v1699_v48, %v1510_v44  ;;  %v3094_v22 = vpop.eup %3093  ;;  %3113 = vtanh.f32 %v1698_v42 }
 0x571   : > { %v3096_v23 = vpop.eup %3095  ;;  %3115 = vtanh.f32 %v1611_v47 }
 0x572   : > { %v3098_v24 = vpop.eup %3097  ;;  %3117 = vtanh.f32 %v1700_v0  ;;  %v2864_v52 = vpack.c.bf16 %v3096_v23, %v3088_v11  ;;  %v1736_v11 = vpop.permute.xlu1 %1735 }
 0x573   : > { %v3100_v63 = vpop.eup %3099  ;;  %v2872_v5 = vpack.c.bf16 %v3098_v24, %v3090_v15  ;;  %v1741_v0 = vpop.permute.xlu0 %1740 }
 0x574   : > { %v3102_v62 = vpop.eup %3101  ;;  %v2862_v21 = vpack.c.bf16 %v3100_v63, %v3092_v20 }
 0x575   : > { %v3104_v25 = vpop.eup %3103  ;;  %v2870_v26 = vpack.c.bf16 %v3102_v62, %v3094_v22 }
 0x576   : > { %v3106_v27 = vpop.eup %3105  ;;  %2863 = vmatprep.subr.bf16.mxu0 %v2862_v21 }
 0x577   : > { %v3108_v28 = vpop.eup %3107  ;;  %2871 = vmatprep.subr.bf16.mxu1 %v2870_v26  ;;  %2865 = vmatpush1.bf16.msra.mxu0 %v2864_v52 }
 0x578   : > { %v3110_v29 = vpop.eup %3109  ;;  %2873 = vmatpush1.bf16.msra.mxu1 %v2872_v5 }
 0x579   : > { %v3112_v30 = vpop.eup %3111 }
 0x57a   : > { %v3114_v31 = vpop.eup %3113  ;;  %v2868_v32 = vpack.c.bf16 %v3112_v30, %v3104_v25  ;;  %v1746_v25 = vpop.permute.xlu1 %1745 }
 0x57b   : > { %v3116_v33 = vpop.eup %3115  ;;  %v2876_v34 = vpack.c.bf16 %v3114_v31, %v3106_v27 }
 0x57c   : > { %v3118_v35 = vpop.eup %3117  ;;  %v2866_v36 = vpack.c.bf16 %v3116_v33, %v3108_v28 }
 0x57d   : > { %v2874_v37 = vpack.c.bf16 %v3118_v35, %v3110_v29 }
 0x57e   : > { %2867 = vmatprep.subr.bf16.mxu0 %v2866_v36 }
 0x57f   : > { %2875 = vmatprep.subr.bf16.mxu1 %v2874_v37  ;;  %2869 = vmatpush1.bf16.msra.mxu0 %v2868_v32 }
 0x580   : > { %2877 = vmatpush1.bf16.msra.mxu1 %v2876_v34 }
 0x582   : > { %2736 = vmatmul.mubr.msk.f32.vlgmr.msra.gmra.mrb[40].mxu0 %vm537_vm0, %v2728_v38 }
 0x583   : > { %2740 = vmatmul.mubr.msk.f32.vlgmr.msra.gmra.mrb[40].mxu1 %vm537_vm0, %v2728_v38  ;;  %1830 = vmatprep.mubr.f32.mxu0 %v3281_v17 }
 0x584   : > { %1919 = vmatprep.mubr.f32.mxu1 %v3281_v17 }
 0x586   : > { %2737 = vmatmul.mubr.msk.f32.gmra.mrb[42].mxu0 %vm537_vm0, %v2729_v39 }
 0x587   : > { %2741 = vmatmul.mubr.msk.f32.gmra.mrb[42].mxu1 %vm537_vm0, %v2729_v39  ;;  %1836 = vmatprep.mubr.f32.mxu0 %v3281_v17 }
 0x588   : > { %1925 = vmatprep.mubr.f32.mxu1 %v3281_v17 }
 0x58a   : > { %2738 = vmatmul.mubr.msk.f32.gmra.mrb[44].mxu0 %vm537_vm0, %v2730_v40 }
 0x58b   : > { %2742 = vmatmul.mubr.msk.f32.gmra.mrb[44].mxu1 %vm537_vm0, %v2730_v40  ;;  %1842 = vmatprep.mubr.f32.mxu0 %v3281_v17 }
 0x58c   : > { %1931 = vmatprep.mubr.f32.mxu1 %v3281_v17 }
 0x58e   : > { %2739 = vmatmul.mubr.msk.f32.gmra.mrb[46].mxu0 %vm537_vm0, %v2731_v51 }
 0x58f   : > { %2743 = vmatmul.mubr.msk.f32.gmra.mrb[46].mxu1 %vm537_vm0, %v2731_v51  ;;  %2076 = vmatprep.mubr.f32.mxu0 %v3281_v17 }
 0x590   : > { %2165 = vmatprep.mubr.f32.mxu1 %v3281_v17 }
 0x655   : > { %v1826_v55 = vpop.f32.mrb[40].mxu0 }
 0x656   : > { %v1827_v56 = vadd.f32 %v1826_v55, %v1731_v54  ;;  %v1915_v58 = vpop.f32.mrb[40].mxu1  ;;  %v1828_v10 = vpop.f32.mrb[41].mxu0 }
 0x657   : > { %v1916_v14 = vadd.f32 %v1915_v58, %v1731_v54  ;;  %v1829_v61 = vadd.f32 %v1828_v10, %v1731_v54  ;;  %v1917_v44 = vpop.f32.mrb[41].mxu1 }
 0x658   : > { %3119 = vtanh.f32 %v1827_v56  ;;  %v1918_v9 = vadd.f32 %v1917_v44, %v1731_v54 }
 0x659   : > { %3121 = vtanh.f32 %v1916_v14  ;;  %v1832_v46 = vpop.f32.mrb[42].mxu0 }
 0x65a   : > { %3123 = vtanh.f32 %v1829_v61  ;;  %v1833_v12 = vadd.f32 %v1832_v46, %v1736_v11  ;;  %v1921_v43 = vpop.f32.mrb[42].mxu1  ;;  %v1834_v15 = vpop.f32.mrb[43].mxu0 }
 0x65b   : > { %3125 = vtanh.f32 %v1918_v9  ;;  %v1922_v42 = vadd.f32 %v1921_v43, %v1736_v11  ;;  %v1835_v47 = vadd.f32 %v1834_v15, %v1736_v11  ;;  %v1923_v48 = vpop.f32.mrb[43].mxu1 }
 0x65c   : > { %3127 = vtanh.f32 %v1833_v12  ;;  %v1924_v20 = vadd.f32 %v1923_v48, %v1736_v11 }
 0x65d   : > { %3129 = vtanh.f32 %v1922_v42  ;;  %v1838_v22 = vpop.f32.mrb[44].mxu0 }
 0x65e   : > { %3131 = vtanh.f32 %v1835_v47  ;;  %v1839_v23 = vadd.f32 %v1838_v22, %v1741_v0  ;;  %v1927_v24 = vpop.f32.mrb[44].mxu1  ;;  %v1840_v52 = vpop.f32.mrb[45].mxu0  ;;  %v2747_v22 = vld [vmem:[%s4071_s3 + $0x78] sm:$0xff] }
 0x65f   : > { %3133 = vtanh.f32 %v1924_v20  ;;  %v1928_v63 = vadd.f32 %v1927_v24, %v1741_v0  ;;  %v1841_v5 = vadd.f32 %v1840_v52, %v1741_v0  ;;  %v1929_v62 = vpop.f32.mrb[45].mxu1 }
 0x660   : > { %3135 = vtanh.f32 %v1839_v23  ;;  %v1930_v21 = vadd.f32 %v1929_v62, %v1741_v0  ;;  %v1983_v23 = vpop.permute.xlu0 %1982 }
 0x661   : > { %3137 = vtanh.f32 %v1928_v63  ;;  %v1844_v26 = vpop.f32.mrb[46].mxu0 }
 0x662   : > { %v3120_v27 = vpop.eup %3119  ;;  %3139 = vtanh.f32 %v1841_v5  ;;  %v1845_v28 = vadd.f32 %v1844_v26, %v1746_v25  ;;  %v1933_v29 = vpop.f32.mrb[46].mxu1 }
 0x663   : > { %v1846_v30 = vpop.f32.mrb[47].mxu0  ;;  %v3122_v31 = vpop.eup %3121  ;;  %3141 = vtanh.f32 %v1930_v21  ;;  %v1934_v32 = vadd.f32 %v1933_v29, %v1746_v25 }
 0x664   : > { %v1847_v33 = vadd.f32 %v1846_v30, %v1746_v25  ;;  %v1935_v34 = vpop.f32.mrb[47].mxu1  ;;  %v3124_v35 = vpop.eup %3123  ;;  %3143 = vtanh.f32 %v1845_v28 }
 0x665   : > { %v1936_v36 = vadd.f32 %v1935_v34, %v1746_v25  ;;  %v3126_v37 = vpop.eup %3125  ;;  %3145 = vtanh.f32 %v1934_v32  ;;  %v3888_v55 = vadd.f32 %v3124_v35, %v3768_v59 }
 0x666   : > { %v3128_v38 = vpop.eup %3127  ;;  %3147 = vtanh.f32 %v1847_v33  ;;  %v3897_v14 = vadd.f32 %v3126_v37, %v3777_v13 }
 0x667   : > { %v3130_v39 = vpop.eup %3129  ;;  %3149 = vtanh.f32 %v1936_v36  ;;  %v3885_v51 = vadd.f32 %v3128_v38, %v3765_v57  ;;  %v3903_v57 = vadd.f32 %v3120_v27, %v3783_v2  ;;  %v1988_v27 = vpop.permute.xlu1 %1987 }
 0x668   : > { %v3132_v40 = vpop.eup %3131  ;;  %v3894_v58 = vadd.f32 %v3130_v39, %v3774_v7  ;;  %v1993_v36 = vpop.permute.xlu0 %1992 }
 0x669   : > { %v3134_v54 = vpop.eup %3133  ;;  %v3891_v56 = vadd.f32 %v3132_v40, %v3771_v60  ;;  %v3908_v60 = vadd.f32 %v3122_v31, %v3788_v8  ;;  %v2880_v13 = vpack.c.bf16 %v3885_v51, %v3903_v57 }
 0x66a   : > { %v3136_v10 = vpop.eup %3135  ;;  %v3900_v61 = vadd.f32 %v3134_v54, %v3780_v45 }
 0x66b   : > { %v3138_v44 = vpop.eup %3137  ;;  %v2878_v59 = vpack.c.bf16 %v3891_v56, %v3888_v55  ;;  %v2888_v45 = vpack.c.bf16 %v3894_v58, %v3908_v60  ;;  %v3935_v0 = vadd.f32 %v3136_v10, %v3815_v6  ;;  %v2745_v6 = vld [vmem:[%s4071_s3 + $0x68] sm:$0xff] }
 0x66c   : > { %v3140_v9 = vpop.eup %3139  ;;  %v2886_v7 = vpack.c.bf16 %v3900_v61, %v3897_v14 }
 0x66d   : > { %v3142_v11 = vpop.eup %3141  ;;  %2879 = vmatprep.subr.bf16.mxu0 %v2878_v59  ;;  %v3920_v15 = vadd.f32 %v3140_v9, %v3800_v16  ;;  %v3940_v16 = vadd.f32 %v3138_v44, %v3820_v4  ;;  %v2746_v4 = vld [vmem:[%s4071_s3 + $0x70] sm:$0xff]  ;;  %v1998_v9 = vpop.permute.xlu1 %1997 }
 0x66e   : > { %v3144_v2 = vpop.eup %3143  ;;  %2887 = vmatprep.subr.bf16.mxu1 %v2886_v7  ;;  %2881 = vmatpush1.bf16.msra.mxu0 %v2880_v13  ;;  %v3929_v48 = vadd.f32 %v3142_v11, %v3809_v1 }
 0x66f   : > { %v3146_v46 = vpop.eup %3145  ;;  %2889 = vmatpush1.bf16.msra.mxu1 %v2888_v45  ;;  %v3917_v8 = vadd.f32 %v3144_v2, %v3797_v41 }
 0x670   : > { %v3148_v12 = vpop.eup %3147  ;;  %v3926_v47 = vadd.f32 %v3146_v46, %v3806_v19 }
 0x671   : > { %v3150_v43 = vpop.eup %3149  ;;  %v3923_v42 = vadd.f32 %v3148_v12, %v3803_v18  ;;  %v2884_v19 = vpack.c.bf16 %v3917_v8, %v3935_v0 }
 0x672   : > { %v3932_v20 = vadd.f32 %v3150_v43, %v3812_v3  ;;  %v2892_v1 = vpack.c.bf16 %v3926_v47, %v3940_v16  ;;  %v2744_v3 = vld [vmem:[%s4071_s3 + $0x60] sm:$0xff] }
 0x673   : > { %v2882_v41 = vpack.c.bf16 %v3923_v42, %v3920_v15 }
 0x674   : > { %v2890_v18 = vpack.c.bf16 %v3932_v20, %v3929_v48 }
 0x675   : > { %2883 = vmatprep.subr.bf16.mxu0 %v2882_v41 }
 0x676   : > { %2891 = vmatprep.subr.bf16.mxu1 %v2890_v18  ;;  %2885 = vmatpush1.bf16.msra.mxu0 %v2884_v19 }
 0x677   : > { %2893 = vmatpush1.bf16.msra.mxu1 %v2892_v1 }
 0x679   : > { %2752 = vmatmul.mubr.msk.f32.vlgmr.msra.gmra.mrb[48].mxu0 %vm537_vm0, %v2744_v3 }
 0x67a   : > { %2756 = vmatmul.mubr.msk.f32.vlgmr.msra.gmra.mrb[48].mxu1 %vm537_vm0, %v2744_v3  ;;  %2082 = vmatprep.mubr.f32.mxu0 %v3281_v17 }
 0x67b   : > { %2171 = vmatprep.mubr.f32.mxu1 %v3281_v17 }
 0x67d   : > { %2753 = vmatmul.mubr.msk.f32.gmra.mrb[50].mxu0 %vm537_vm0, %v2745_v6 }
 0x67e   : > { %2757 = vmatmul.mubr.msk.f32.gmra.mrb[50].mxu1 %vm537_vm0, %v2745_v6  ;;  %2088 = vmatprep.mubr.f32.mxu0 %v3281_v17 }
 0x67f   : > { %2177 = vmatprep.mubr.f32.mxu1 %v3281_v17 }
 0x681   : > { %2754 = vmatmul.mubr.msk.f32.gmra.mrb[52].mxu0 %vm537_vm0, %v2746_v4 }
 0x682   : > { %2758 = vmatmul.mubr.msk.f32.gmra.mrb[52].mxu1 %vm537_vm0, %v2746_v4  ;;  %2094 = vmatprep.mubr.f32.mxu0 %v3281_v17 }
 0x683   : > { %2183 = vmatprep.mubr.f32.mxu1 %v3281_v17 }
 0x685   : > { %2755 = vmatmul.mubr.msk.f32.gmra.mrb[54].mxu0 %vm537_vm0, %v2747_v22 }
 0x686   : > { %2759 = vmatmul.mubr.msk.f32.gmra.mrb[54].mxu1 %vm537_vm0, %v2747_v22  ;;  %2312 = vmatprep.mubr.f32.mxu0 %v3281_v17 }
 0x687   : > { %2401 = vmatprep.mubr.f32.mxu1 %v3281_v17 }
 0x74c   : > { %v2078_v24 = vpop.f32.mrb[48].mxu0 }
 0x74d   : > { %v2079_v52 = vadd.f32 %v2078_v24, %v1983_v23  ;;  %v2167_v63 = vpop.f32.mrb[48].mxu1  ;;  %v2080_v5 = vpop.f32.mrb[49].mxu0 }
 0x74e   : > { %v2168_v62 = vadd.f32 %v2167_v63, %v1983_v23  ;;  %v2081_v21 = vadd.f32 %v2080_v5, %v1983_v23  ;;  %v2169_v25 = vpop.f32.mrb[49].mxu1 }
 0x74f   : > { %3151 = vtanh.f32 %v2079_v52  ;;  %v2170_v26 = vadd.f32 %v2169_v25, %v1983_v23 }
 0x750   : > { %3153 = vtanh.f32 %v2168_v62  ;;  %v2084_v28 = vpop.f32.mrb[50].mxu0 }
 0x751   : > { %3155 = vtanh.f32 %v2081_v21  ;;  %v2085_v29 = vadd.f32 %v2084_v28, %v1988_v27  ;;  %v2173_v30 = vpop.f32.mrb[50].mxu1  ;;  %v2086_v31 = vpop.f32.mrb[51].mxu0 }
 0x752   : > { %3157 = vtanh.f32 %v2170_v26  ;;  %v2174_v32 = vadd.f32 %v2173_v30, %v1988_v27  ;;  %v2087_v33 = vadd.f32 %v2086_v31, %v1988_v27  ;;  %v2175_v34 = vpop.f32.mrb[51].mxu1 }
 0x753   : > { %3159 = vtanh.f32 %v2085_v29  ;;  %v2176_v35 = vadd.f32 %v2175_v34, %v1988_v27  ;;  %v2760_v34 = vld [vmem:[%s4073_s5 + $0x60] sm:$0xff] }
 0x754   : > { %3161 = vtanh.f32 %v2174_v32  ;;  %v2090_v37 = vpop.f32.mrb[52].mxu0 }
 0x755   : > { %3163 = vtanh.f32 %v2087_v33  ;;  %v2091_v38 = vadd.f32 %v2090_v37, %v1993_v36  ;;  %v2179_v39 = vpop.f32.mrb[52].mxu1  ;;  %v2092_v40 = vpop.f32.mrb[53].mxu0  ;;  %v2763_v37 = vld [vmem:[%s4073_s5 + $0x78] sm:$0xff] }
 0x756   : > { %3165 = vtanh.f32 %v2176_v35  ;;  %v2180_v54 = vadd.f32 %v2179_v39, %v1993_v36  ;;  %v2093_v10 = vadd.f32 %v2092_v40, %v1993_v36  ;;  %v2181_v44 = vpop.f32.mrb[53].mxu1  ;;  %v2761_v35 = vld [vmem:[%s4073_s5 + $0x68] sm:$0xff] }
 0x757   : > { %3167 = vtanh.f32 %v2091_v38  ;;  %v2182_v59 = vadd.f32 %v2181_v44, %v1993_v36  ;;  %v2762_v36 = vld [vmem:[%s4073_s5 + $0x70] sm:$0xff]  ;;  %v2219_v38 = vpop.permute.xlu0 %2218 }
 0x758   : > { %3169 = vtanh.f32 %v2180_v54  ;;  %v2096_v7 = vpop.f32.mrb[54].mxu0 }
 0x759   : > { %v3152_v13 = vpop.eup %3151  ;;  %3171 = vtanh.f32 %v2093_v10  ;;  %v2097_v11 = vadd.f32 %v2096_v7, %v1998_v9  ;;  %v2185_v45 = vpop.f32.mrb[54].mxu1 }
 0x75a   : > { %v2098_v2 = vpop.f32.mrb[55].mxu0  ;;  %v3154_v46 = vpop.eup %3153  ;;  %3173 = vtanh.f32 %v2182_v59  ;;  %v2186_v12 = vadd.f32 %v2185_v45, %v1998_v9 }
 0x75b   : > { %v2099_v43 = vadd.f32 %v2098_v2, %v1998_v9  ;;  %v2187_v41 = vpop.f32.mrb[55].mxu1  ;;  %v3156_v18 = vpop.eup %3155  ;;  %3175 = vtanh.f32 %v2097_v11 }
 0x75c   : > { %v2188_v19 = vadd.f32 %v2187_v41, %v1998_v9  ;;  %v3158_v1 = vpop.eup %3157  ;;  %3177 = vtanh.f32 %v2186_v12 }
 0x75d   : > { %v3160_v3 = vpop.eup %3159  ;;  %3179 = vtanh.f32 %v2099_v43 }
 0x75e   : > { %v3162_v6 = vpop.eup %3161  ;;  %3181 = vtanh.f32 %v2188_v19  ;;  %v2896_v4 = vpack.c.bf16 %v3160_v3, %v3152_v13  ;;  %v2224_v13 = vpop.permute.xlu1 %2223 }
 0x75f   : > { %v3164_v22 = vpop.eup %3163  ;;  %v2904_v23 = vpack.c.bf16 %v3162_v6, %v3154_v46 }
 0x760   : > { %v3166_v24 = vpop.eup %3165  ;;  %v2894_v52 = vpack.c.bf16 %v3164_v22, %v3156_v18  ;;  %v2229_v18 = vpop.permute.xlu0 %2228 }
 0x761   : > { %v3168_v63 = vpop.eup %3167  ;;  %v2902_v5 = vpack.c.bf16 %v3166_v24, %v3158_v1 }
 0x762   : > { %v3170_v62 = vpop.eup %3169  ;;  %2895 = vmatprep.subr.bf16.mxu0 %v2894_v52  ;;  %v2234_v52 = vpop.permute.xlu1 %2233 }
 0x763   : > { %v3172_v21 = vpop.eup %3171  ;;  %2903 = vmatprep.subr.bf16.mxu1 %v2902_v5  ;;  %2897 = vmatpush1.bf16.msra.mxu0 %v2896_v4 }
 0x764   : > { %v3174_v25 = vpop.eup %3173  ;;  %2905 = vmatpush1.bf16.msra.mxu1 %v2904_v23 }
 0x765   : > { %v3176_v26 = vpop.eup %3175 }
 0x766   : > { %v3178_v27 = vpop.eup %3177  ;;  %v2900_v28 = vpack.c.bf16 %v3176_v26, %v3168_v63 }
 0x767   : > { %v3180_v29 = vpop.eup %3179  ;;  %v2908_v30 = vpack.c.bf16 %v3178_v27, %v3170_v62 }
 0x768   : > { %v3182_v31 = vpop.eup %3181  ;;  %v2898_v32 = vpack.c.bf16 %v3180_v29, %v3172_v21 }
 0x769   : > { %v2906_v33 = vpack.c.bf16 %v3182_v31, %v3174_v25 }
 0x76a   : > { %2899 = vmatprep.subr.bf16.mxu0 %v2898_v32 }
 0x76b   : > { %2907 = vmatprep.subr.bf16.mxu1 %v2906_v33  ;;  %2901 = vmatpush1.bf16.msra.mxu0 %v2900_v28 }
 0x76c   : > { %2909 = vmatpush1.bf16.msra.mxu1 %v2908_v30 }
 0x76e   : > { %2768 = vmatmul.mubr.msk.f32.vlgmr.msra.gmra.mrb[56].mxu0 %vm537_vm0, %v2760_v34 }
 0x76f   : > { %2772 = vmatmul.mubr.msk.f32.vlgmr.msra.gmra.mrb[56].mxu1 %vm537_vm0, %v2760_v34  ;;  %2318 = vmatprep.mubr.f32.mxu0 %v3281_v17 }
 0x770   : > { %2407 = vmatprep.mubr.f32.mxu1 %v3281_v17 }
 0x772   : > { %2769 = vmatmul.mubr.msk.f32.gmra.mrb[58].mxu0 %vm537_vm0, %v2761_v35 }
 0x773   : > { %2773 = vmatmul.mubr.msk.f32.gmra.mrb[58].mxu1 %vm537_vm0, %v2761_v35  ;;  %2324 = vmatprep.mubr.f32.mxu0 %v3281_v17  ;;  %v2465_v35 = vpop.permute.xlu0 %2464 }
 0x774   : > { %2413 = vmatprep.mubr.f32.mxu1 %v3281_v17 }
 0x776   : > { %2770 = vmatmul.mubr.msk.f32.gmra.mrb[60].mxu0 %vm537_vm0, %v2762_v36 }
 0x777   : > { %2774 = vmatmul.mubr.msk.f32.gmra.mrb[60].mxu1 %vm537_vm0, %v2762_v36  ;;  %2330 = vmatprep.mubr.f32.mxu0 %v3281_v17 }
 0x778   : > { %2419 = vmatprep.mubr.f32.mxu1 %v3281_v17 }
 0x77a   : > { %2771 = vmatmul.mubr.msk.f32.gmra.mrb[62].mxu0 %vm537_vm0, %v2763_v37 }
 0x77b   : > { %2775 = vmatmul.mubr.msk.f32.gmra.mrb[62].mxu1 %vm537_vm0, %v2763_v37 }
 0x841   : > { %v2314_v39 = vpop.f32.mrb[56].mxu0 }
 0x842   : > { %v2315_v40 = vadd.f32 %v2314_v39, %v2219_v38  ;;  %v2403_v54 = vpop.f32.mrb[56].mxu1  ;;  %v2316_v10 = vpop.f32.mrb[57].mxu0 }
 0x843   : > { %v2404_v44 = vadd.f32 %v2403_v54, %v2219_v38  ;;  %v2317_v59 = vadd.f32 %v2316_v10, %v2219_v38  ;;  %v2405_v9 = vpop.f32.mrb[57].mxu1  ;;  %v2470_v54 = vpop.permute.xlu1 %2469 }
 0x844   : > { %3183 = vtanh.f32 %v2315_v40  ;;  %v2406_v7 = vadd.f32 %v2405_v9, %v2219_v38 }
 0x845   : > { %3185 = vtanh.f32 %v2404_v44  ;;  %v2320_v11 = vpop.f32.mrb[58].mxu0 }
 0x846   : > { %3187 = vtanh.f32 %v2317_v59  ;;  %v2321_v45 = vadd.f32 %v2320_v11, %v2224_v13  ;;  %v2409_v17 = vpop.f32.mrb[58].mxu1  ;;  %v2322_v2 = vpop.f32.mrb[59].mxu0 }
 0x847   : > { %3189 = vtanh.f32 %v2406_v7  ;;  %v2410_v46 = vadd.f32 %v2409_v17, %v2224_v13  ;;  %v2323_v12 = vadd.f32 %v2322_v2, %v2224_v13  ;;  %v2411_v43 = vpop.f32.mrb[59].mxu1 }
 0x848   : > { %3191 = vtanh.f32 %v2321_v45  ;;  %v2412_v41 = vadd.f32 %v2411_v43, %v2224_v13 }
 0x849   : > { %3193 = vtanh.f32 %v2410_v46  ;;  %v2326_v19 = vpop.f32.mrb[60].mxu0 }
 0x84a   : > { %3195 = vtanh.f32 %v2323_v12  ;;  %v2327_v1 = vadd.f32 %v2326_v19, %v2229_v18  ;;  %v2415_v3 = vpop.f32.mrb[60].mxu1  ;;  %v2328_v6 = vpop.f32.mrb[61].mxu0 }
 0x84b   : > { %3197 = vtanh.f32 %v2412_v41  ;;  %v2416_v4 = vadd.f32 %v2415_v3, %v2229_v18  ;;  %v2329_v22 = vadd.f32 %v2328_v6, %v2229_v18  ;;  %v2417_v23 = vpop.f32.mrb[61].mxu1 }
 0x84c   : > { %3199 = vtanh.f32 %v2327_v1  ;;  %v2418_v24 = vadd.f32 %v2417_v23, %v2229_v18 }
 0x84d   : > { %3201 = vtanh.f32 %v2416_v4  ;;  %v2332_v63 = vpop.f32.mrb[62].mxu0 }
 0x84e   : > { %v3184_v5 = vpop.eup %3183  ;;  %3203 = vtanh.f32 %v2329_v22  ;;  %v2333_v62 = vadd.f32 %v2332_v63, %v2234_v52  ;;  %v2421_v21 = vpop.f32.mrb[62].mxu1 }
 0x84f   : > { %v2334_v25 = vpop.f32.mrb[63].mxu0  ;;  %v3186_v26 = vpop.eup %3185  ;;  %3205 = vtanh.f32 %v2418_v24  ;;  %v2422_v27 = vadd.f32 %v2421_v21, %v2234_v52  ;;  %v2442_v33 = vadd.f32 %v3184_v5, %v3903_v57 }
 0x850   : > { %v2335_v28 = vadd.f32 %v2334_v25, %v2234_v52  ;;  %v2423_v29 = vpop.f32.mrb[63].mxu1  ;;  %v3188_v30 = vpop.eup %3187  ;;  %3207 = vtanh.f32 %v2333_v62  ;;  %v2444_v36 = vadd.f32 %v3186_v26, %v3908_v60 }
 0x851   : > { %v2424_v31 = vadd.f32 %v2423_v29, %v2234_v52  ;;  %v3190_v32 = vpop.eup %3189  ;;  %3209 = vtanh.f32 %v2422_v27  ;;  %v2443_v38 = vadd.f32 %v3188_v30, %v3888_v55  ;;  %v2482_v57 = vmul.f32 %v2465_v35, %v2442_v33  ;;  %v2480_v5 = vpop.permute.xlu1 %2479 }
 0x852   : > { %v3192_v34 = vpop.eup %3191  ;;  %3211 = vtanh.f32 %v2335_v28  ;;  %v2445_v10 = vadd.f32 %v3190_v32, %v3897_v14  ;;  %v2484_v60 = vmul.f32 %v2465_v35, %v2444_v36  ;;  %v2475_v14 = vpop.permute.xlu0 %2474 }
 0x853   : > { %v3194_v37 = vpop.eup %3193  ;;  %v2446_v39 = vadd.f32 %v3192_v34, %v3885_v51  ;;  %3213 = vtanh.f32 %v2424_v31  ;;  %v2483_v17 = vmul.f32 %v2465_v35, %v2443_v38 }
 0x854   : > { %v3196_v40 = vpop.eup %3195  ;;  %v2448_v44 = vadd.f32 %v3194_v37, %v3894_v58  ;;  %v2485_v43 = vmul.f32 %v2465_v35, %v2445_v10 }
 0x855   : > { %v3198_v59 = vpop.eup %3197  ;;  %v2486_v9 = vmul.f32 %v2470_v54, %v2446_v39  ;;  %v2447_v7 = vadd.f32 %v3196_v40, %v3891_v56 }
 0x856   : > { %v3200_v13 = vpop.eup %3199  ;;  %v2488_v11 = vmul.f32 %v2470_v54, %v2448_v44  ;;  %v2449_v45 = vadd.f32 %v3198_v59, %v3900_v61 }
 0x857   : > { %v3202_v55 = vpop.eup %3201  ;;  %v2498_v51 = vadd.f32 %v2486_v9, %v2482_v57  ;;  %v2487_v2 = vmul.f32 %v2470_v54, %v2447_v7  ;;  %v2450_v46 = vadd.f32 %v3200_v13, %v3935_v0  ;;  %v2538_v9 = vpop.permute.xlu0 %2537 }
 0x858   : > { %v3204_v12 = vpop.eup %3203  ;;  %v2516_v58 = vadd.f32 %v2488_v11, %v2484_v60  ;;  %v2489_v41 = vmul.f32 %v2470_v54, %v2449_v45  ;;  %v2452_v18 = vadd.f32 %v3202_v55, %v3940_v16 }
 0x859   : > { %v3206_v19 = vpop.eup %3205  ;;  %v2507_v56 = vadd.f32 %v2487_v2, %v2483_v17  ;;  %v2490_v1 = vmul.f32 %v2475_v14, %v2450_v46  ;;  %v2451_v3 = vadd.f32 %v3204_v12, %v3920_v15  ;;  %v2543_v17 = vrot.slane %v2538_v9, %v3529_v53 }
 0x85a   : > { %v3208_v6 = vpop.eup %3207  ;;  %v2525_v61 = vadd.f32 %v2489_v41, %v2485_v43  ;;  %v2492_v4 = vmul.f32 %v2475_v14, %v2452_v18  ;;  %v2453_v22 = vadd.f32 %v3206_v19, %v3929_v48 }
 0x85b   : > { %v3210_v23 = vpop.eup %3209  ;;  %v2499_v24 = vadd.f32 %v2498_v51, %v2490_v1  ;;  %v2491_v0 = vmul.f32 %v2475_v14, %v2451_v3  ;;  %v2454_v52 = vadd.f32 %v3208_v6, %v3917_v8 }
 0x85c   : > { %v3212_v63 = vpop.eup %3211  ;;  %v2517_v62 = vadd.f32 %v2516_v58, %v2492_v4  ;;  %v2493_v21 = vmul.f32 %v2475_v14, %v2453_v22  ;;  %v2456_v16 = vadd.f32 %v3210_v23, %v3926_v47 }
 0x85d   : > { %v3214_v25 = vpop.eup %3213  ;;  %v2508_v26 = vadd.f32 %v2507_v56, %v2491_v0  ;;  %v2494_v27 = vmul.f32 %v2480_v5, %v2454_v52  ;;  %v2455_v15 = vadd.f32 %v3212_v63, %v3923_v42 }
 0x85e   : > { %v2526_v28 = vadd.f32 %v2525_v61, %v2493_v21  ;;  %v2496_v29 = vmul.f32 %v2480_v5, %v2456_v16  ;;  %v2457_v48 = vadd.f32 %v3214_v25, %v3932_v20  ;;  %v3282_v20 = vmov 1966171168  }
 0x85f   : > { %v2500_v30 = vadd.f32 %v2499_v24, %v2494_v27  ;;  %v2495_v31 = vmul.f32 %v2480_v5, %v2455_v15  ;;  %v2555_v57 = vunpack.c.l.s4 %v3282_v20 }
 0x860   : > { %v2518_v32 = vadd.f32 %v2517_v62, %v2496_v29  ;;  %v2497_v33 = vmul.f32 %v2480_v5, %v2457_v48 }
 0x861   : > { %v2501_v8 = vrot.slane %v2500_v30, 4  ;;  %v2509_v34 = vadd.f32 %v2508_v26, %v2495_v31  ;;  %v2556_v46 = vunpack.c.0.s8 %v2555_v57 }
 0x862   : > { %v2519_v35 = vrot.slane %v2518_v32, 4  ;;  %v2527_v36 = vadd.f32 %v2526_v28, %v2497_v33 }
 0x863   : > { %v2502_v37 = vadd.f32 %v2501_v8, %v2500_v30  ;;  %v2510_v38 = vrot.slane %v2509_v34, 4  ;;  %v2559_v56 = vsub.s32 %v2556_v46, %v3521_v50 }
 0x864   : > { %v2520_v47 = vadd.f32 %v2519_v35, %v2518_v32  ;;  %v2528_v39 = vrot.slane %v2527_v36, 4 }
 0x865   : > { %v2503_v40 = vrot.slane %v2502_v37, 2  ;;  %v2511_v54 = vadd.f32 %v2510_v38, %v2509_v34 }
 0x866   : > { %v2521_v10 = vrot.slane %v2520_v47, 2  ;;  %v2529_v42 = vadd.f32 %v2528_v39, %v2527_v36 }
 0x867   : > { %v2512_v44 = vrot.slane %v2511_v54, 2  ;;  %v2504_v59 = vadd.f32 %v2503_v40, %v2502_v37 }
 0x868   : > { %v2530_v7 = vrot.slane %v2529_v42, 2  ;;  %v2522_v13 = vadd.f32 %v2521_v10, %v2520_v47 }
 0x869   : > { %v2505_v60 = vrot.slane %v2504_v59, 1  ;;  %v2513_v11 = vadd.f32 %v2512_v44, %v2511_v54 }
 0x86a   : > { %v2523_v45 = vrot.slane %v2522_v13, 1  ;;  %v2531_v55 = vadd.f32 %v2530_v7, %v2529_v42 }
 0x86b   : > { %v2506_v51 = vadd.f32 %v2505_v60, %v2504_v59  ;;  %v2514_v2 = vrot.slane %v2513_v11, 1 }
 0x86c   : > { %v2524_v12 = vadd.f32 %v2523_v45, %v2522_v13  ;;  %v2532_v14 = vrot.slane %v2531_v55, 1 }
 0x86d   : > { %v2515_v43 = vadd.f32 %v2514_v2, %v2513_v11  ;;  %v2544_v58 = vadd.f32 %v2543_v17, %v2506_v51 }
 0x86e   : > { %v2533_v41 = vadd.f32 %v2532_v14, %v2531_v55  ;;  %v2546_v18 = vadd.f32 %v2543_v17, %v2524_v12 }
 0x86f   : > { %v2545_v19 = vadd.f32 %v2543_v17, %v2515_v43 }
 0x870   : > { %v2547_v1 = vadd.f32 %v2543_v17, %v2533_v41 }
 0x871   : > { %v2552_v3 = vcombine.low %v2544_v58, %v2545_v19 }
 0x872   : > { %v2553_v6 = vcombine.low %v2546_v18, %v2547_v1 }
 0x873   : > { %v2560_v53 = vrot.slane %v2552_v3, %v2559_v56 }
 0x874   : > { %v2567_v61 = vrot.slane %v2553_v6, %v2559_v56 }
 0x876   : > { %v2568_v4 = vcombine.low %v2560_v53, %v2567_v61 }
 0x878   : > { %v2575_v22 = vrot.slane %v2568_v4, %v2559_v56 }
 0x87a   : > { %2581 = vst.msk [vmem:[%s328_s26] sm:$0xf] %vm2579_vm1, %v2575_v22 }
 0x87b   : > { %3228 = shalt.err (!%p3225_p3)
}
 0x87c   : > { %s3229_s22 = scalar_lea.hbm %s4026_s30, 64  ;;  %s3233_s25 = scalar_lea.hbm %s4077_s9, 128 }
 0x87d   : > { %p3230_p4 = scmp.ne.s32.totalorder %s4026_s30, %s3229_s22  ;;  %p3234_p9 = scmp.lt.u32.totalorder %s4026_s30, %s4077_s9 }
 0x87e   : > { %p3235_p10 = scmp.lt.u32.totalorder %s3233_s25, %s3229_s22  ;;  %p3237_p12 = scmp.lt.u32.totalorder %s3229_s22, %s4026_s30 }
 0x87f   : > { %p3231_p7 = pnand %p3230_p4, %p3375_p5 }
 0x880   : > { %p3236_p11 = por %p3235_p10, %p3234_p9 }
 0x881   : > { %p3232_p8 = pneg %p3231_p7 }
 0x882   : > { %p3238_p13 = por %p3237_p12, %p3236_p11 }
 0x884   : > { %p3239_p0 = pnand %p3238_p13, %p3232_p8 }
 0x886   : > { %3242 = shalt.err (!%p3239_p0)
}
 0x887   : > { %2910 = dma.vmem_to_hbm [thread:$0]  (%p3375_p5), %s4028_s27, 64, %s4026_s30, %s2583_s10  }
 0x888 PF: > { %p2916_p1 = scmp.ge.s32.totalorder %s3277_s14, 2  ;;  %s2609_s29 = sand.u32 1, %s3265_s11  }
 0x889   : > { %s2610_s15 = scalar_lea.sflag [#allocation4], %s2609_s29 }
 0x88a   : > { %p2913_p2 = pnand %p2916_p1, %p3379_p6 }
 0x88c   : > { %3260 = dma.done.wait (!%p2913_p2), %s2610_s15, 64  }
 0x88d   : > { %3262 = vsyncadd (!%p2913_p2), %s2610_s15, 4294967232  ;;  %p21_p3 = scmp.ge.s32.totalorder %s3362_s16, 4   ;;  %s4080_s11 = smov %s3269_s12 }
 0x88e   : > { %s4081_s12 = smov %s3273_s13  ;;  %s4082_s13 = smov %s3373_s19 }
 0x88f   : > { %s4083_s14 = smov %s3362_s16  ;;  %23 = sbr.rel (!%p21_p3) target bundleno = 6 (0x6), region = 104 }
 0x896   :  { %2615 = vsyncpa [#allocation4], 1 }
 0x897   :  { %2617 = vsyncpa [#allocation4 + $0x1], 1 }

</bundles_post_ra>
